<compile_context>
chip_gen: v6e
topology: v6e:2x2x1
jax: 0.10.0
libtpu: 0.0.40
codegen_flags: <defaults>
</compile_context>

<pallas_src>
import functools

import jax
import jax.numpy as jnp
from jax import lax
from jax.experimental import pallas as pl
from jax.experimental.pallas import tpu as pltpu


def _round_up(x, m):
    return ((x + m - 1) // m) * m


# ---------------------------------------------------------------------------
# Fused Pallas kernel: n_layers LSTM + tanh + bias-free linear head.
# One grid step = one batch tile (Bt rows) through all T steps and all layers.
# ---------------------------------------------------------------------------
def _make_fused_kernel(n_layers, T, Tc, Bt, H):
    H3 = 3 * H
    CB = Tc * Bt                  # rows per time chunk
    n_chunks = T // Tc

    def kernel(*refs):
        # refs = [x, (wih, whh, b) * n_layers, wlin, out, act_scr, gates_scr]
        x_ref = refs[0]                              # (T*Bt, F0p)    bf16
        layer_refs = refs[1:1 + 3 * n_layers]
        wlin_ref = refs[1 + 3 * n_layers]            # (H, Pp)        bf16
        o_ref = refs[2 + 3 * n_layers]               # (T*Bt, Pp)     f32
        act_scr = refs[3 + 3 * n_layers]             # (T*Bt, H)      bf16
        gates_scr = refs[4 + 3 * n_layers]           # (2, Tc*Bt, 4H) f32

        for l in range(n_layers):
            wih = layer_refs[3 * l + 0][...]         # (F, 4H)  bf16
            whh = layer_refs[3 * l + 1][...]         # (H, 4H)  bf16
            b = layer_refs[3 * l + 2][...]           # (1, 4H)  f32 (biases fused)

            # -- Phase A (per chunk): hoisted input->gates MXU matmul ---------
            def gate_chunk(ck, slot, wih=wih, b=b, l=l):
                r0 = ck * CB                          # static
                if l == 0:
                    inp = x_ref[pl.ds(r0, CB), :]     # bf16
                else:
                    inp = act_scr[pl.ds(r0, CB), :]   # bf16 (layer l-1 output)
                gates_scr[slot] = (
                    jnp.dot(inp, wih, preferred_element_type=jnp.float32) + b)

            gate_chunk(0, 0)

            h = jnp.zeros((Bt, H), jnp.float32)
            c = jnp.zeros((Bt, H), jnp.float32)

            for ck in range(n_chunks):
                slot = ck & 1
                # Issue the next chunk's MXU matmul *before* this chunk's
                # recurrence: no data dependency between them, so the
                # scheduler can hide the MXU work under the EUP/VPU-bound
                # serialized recurrence.  The chunk-(ck+1) act rows it reads
                # are only overwritten by the chunk-(ck+1) recurrence, which
                # depends on these gate values -> ordering stays explicit.
                if ck + 1 < n_chunks:
                    gate_chunk(ck + 1, 1 - slot)

                # -- Phase B: recurrence (h @ W_hh + gate nonlinearities) -----
                def step(t, carry, slot=slot, ck=ck, whh=whh):
                    h, c = carry
                    row = pl.multiple_of(t * Bt, Bt)
                    g_all = gates_scr[slot, pl.ds(row, Bt), :] + jnp.dot(
                        h.astype(jnp.bfloat16), whh,
                        preferred_element_type=jnp.float32)
                    # gate columns pre-ordered host-side as (i, f, o | g):
                    sig = jax.nn.sigmoid(g_all[:, :H3])      # i, f, o (f32)
                    g = jnp.tanh(g_all[:, H3:])              # cell candidate
                    i_g = sig[:, 0 * H:1 * H]
                    f_g = sig[:, 1 * H:2 * H]
                    o_g = sig[:, 2 * H:3 * H]
                    c = f_g * c + i_g * g
                    h = o_g * jnp.tanh(c)
                    act_row = pl.multiple_of(ck * CB + t * Bt, Bt)
                    act_scr[pl.ds(act_row, Bt), :] = h.astype(jnp.bfloat16)
                    return (h, c)

                h, c = lax.fori_loop(0, Tc, step, (h, c),
                                     unroll=min(Tc, 4))

        # -- Head: fused tanh (f32) + bias-free bf16 linear -------------------
        head_in = jnp.tanh(act_scr[...].astype(jnp.float32)).astype(jnp.bfloat16)
        o_ref[...] = jnp.dot(head_in, wlin_ref[...],
                             preferred_element_type=jnp.float32
                             ).astype(o_ref.dtype)

    return kernel


# ---------------------------------------------------------------------------
# One-time parameter preparation (transpose, gate reorder, bias/M fuse, pad,
# bf16 cast).  Must be re-run whenever the PyTorch parameters change.
# ---------------------------------------------------------------------------
def _reorder_gates(w, H):
    """PyTorch gate order (i, f, g, o) -> (i, f, o, g) along axis 0."""
    i, f, g, o = jnp.split(w, 4, axis=0)
    return jnp.concatenate([i, f, o, g], axis=0)


def _head_pad(out_dim):
    # Pad the head output to 128 lanes only when it is already near 128;
    # small out_dim stays unpadded to avoid HBM writeback amplification.
    return _round_up(out_dim, 128) if out_dim >= 64 else out_dim


def prepare_params(params, *, input_dim, hidden_dim, n_layers, output_dim):
    H = hidden_dim
    F0p = _round_up(input_dim, 8)
    out_dim = 2 * output_dim * output_dim
    Pp = _head_pad(out_dim)
    M = params["M"].astype(jnp.float32).reshape(())

    prep = {}
    for l in range(n_layers):
        w_ih = params[f"w_ih_{l}"].astype(jnp.float32)            # (4H, Fin)
        w_hh = params[f"w_hh_{l}"].astype(jnp.float32)            # (4H, H)
        b = (params[f"b_ih_{l}"] + params[f"b_hh_{l}"]).astype(jnp.float32)
        if l == 0:
            # Fold the constant M feature (last input column) into the bias
            # and drop that column: numerically identical, removes the
            # concat + extra padded input column in the wrapper.
            b = b + M * w_ih[:, input_dim]
            w_ih = w_ih[:, :input_dim]
        w_ih = _reorder_gates(w_ih, H).T                          # (Fin, 4H)
        w_hh = _reorder_gates(w_hh, H).T                          # (H, 4H)
        b = _reorder_gates(b, H).reshape(1, -1)                   # (1, 4H)
        if l == 0 and F0p != input_dim:
            w_ih = jnp.pad(w_ih, ((0, F0p - input_dim), (0, 0)))  # (F0p, 4H)
        prep[f"wih_{l}"] = w_ih.astype(jnp.bfloat16)
        prep[f"whh_{l}"] = w_hh.astype(jnp.bfloat16)
        prep[f"b_{l}"] = b                                        # f32
    w_lin = params["w_lin"].astype(jnp.float32).T                 # (H, out_dim)
    if Pp != out_dim:
        w_lin = jnp.pad(w_lin, ((0, 0), (0, Pp - out_dim)))
    prep["wlin"] = w_lin.astype(jnp.bfloat16)                     # (H, Pp)
    return prep


# ---------------------------------------------------------------------------
# Forward wrapper
# ---------------------------------------------------------------------------
@functools.partial(
    jax.jit,
    static_argnames=("input_dim", "output_dim", "hidden_dim", "n_layers"))
def lstm_regressor_with_h_forward(input_path, prep, *, input_dim, output_dim,
                                  hidden_dim, n_layers):
    B, T, _ = input_path.shape
    H = hidden_dim
    F0p = _round_up(input_dim, 8)
    out_dim = 2 * output_dim * output_dim
    Pp = _head_pad(out_dim)

    # Batch tiling: Bt rows per grid step (sublane multiple), grid over tiles.
    Bp8 = _round_up(B, 8)
    Bt = min(Bp8, 64)
    Bp = _round_up(Bp8, Bt)
    nb = Bp // Bt

    # Time chunk for the hoisted gates matmul: largest divisor of T <= 4,
    # bounding the gates scratch to 2*Tc*Bt*4H and enabling MXU/recurrence
    # overlap across chunks.
    Tc = 1
    for d in range(1, min(T, 4) + 1):
        if T % d == 0:
            Tc = d

    # Input plumbing: time-major within each batch tile, batch-padded,
    # feature-padded (M column already folded into the layer-0 bias), bf16.
    x = input_path.astype(jnp.float32)                            # (B,T,F0)
    x = jnp.transpose(x, (1, 0, 2))                               # (T,B,F0)
    x = jnp.pad(x, ((0, 0), (0, Bp - B), (0, F0p - input_dim)))   # (T,Bp,F0p)
    x = x.reshape(T, nb, Bt, F0p).transpose(1, 0, 2, 3)           # (nb,T,Bt,F0p)
    x = x.reshape(nb, T * Bt, F0p).astype(jnp.bfloat16)

    in_specs = [pl.BlockSpec((None, T * Bt, F0p), lambda j: (j, 0, 0))]
    args = [x]
    for l in range(n_layers):
        for name in (f"wih_{l}", f"whh_{l}", f"b_{l}"):
            in_specs.append(pl.BlockSpec(prep[name].shape, lambda j: (0, 0)))
            args.append(prep[name])
    in_specs.append(pl.BlockSpec(prep["wlin"].shape, lambda j: (0, 0)))
    args.append(prep["wlin"])

    y = pl.pallas_call(
        _make_fused_kernel(n_layers, T, Tc, Bt, H),
        out_shape=jax.ShapeDtypeStruct((nb, T * Bt, Pp), jnp.float32),
        grid=(nb,),
        in_specs=in_specs,
        out_specs=pl.BlockSpec((None, T * Bt, Pp), lambda j: (j, 0, 0)),
        scratch_shapes=[
            pltpu.VMEM((T * Bt, H), jnp.bfloat16),           # inter-layer acts
            pltpu.VMEM((2, Tc * Bt, 4 * H), jnp.float32),    # gates ping-pong
        ],
        compiler_params=pltpu.CompilerParams(
            dimension_semantics=("parallel",),
            vmem_limit_bytes=32 * 1024 * 1024),
    )(*args)

    # Undo tiling / padding, assemble complex output.
    y = y[..., :out_dim]
    y = y.reshape(nb, T, Bt, out_dim).transpose(1, 0, 2, 3).reshape(T, Bp, out_dim)
    y = y[:, :B].reshape(T, B, 2, output_dim, output_dim)
    y = jnp.transpose(y, (1, 0, 2, 3, 4))                         # (B,T,2,D,D)
    return y[:, :, 0] + 1j * y[:, :, 1]                           # complex64


# ---------------------------------------------------------------------------
# Pure-JAX f32 reference (PyTorch gate order) for correctness check
# ---------------------------------------------------------------------------
def _reference_forward(input_path, params, n_layers, output_dim):
    B, T, _ = input_path.shape
    m_col = jnp.broadcast_to(params["M"].reshape(1, 1, 1), (B, T, 1))
    x = jnp.concatenate([input_path.astype(jnp.float32), m_col], axis=2)
    for l in range(n_layers):
        w_ih = params[f"w_ih_{l}"]
        w_hh = params[f"w_hh_{l}"]
        b = params[f"b_ih_{l}"] + params[f"b_hh_{l}"]
        H = w_hh.shape[1]
        h = jnp.zeros((B, H), jnp.float32)
        c = jnp.zeros((B, H), jnp.float32)
        outs = []
        for t in range(T):
            gates = x[:, t, :] @ w_ih.T + h @ w_hh.T + b
            i = jax.nn.sigmoid(gates[:, 0 * H:1 * H])
            f = jax.nn.sigmoid(gates[:, 1 * H:2 * H])
            g = jnp.tanh(gates[:, 2 * H:3 * H])
            o = jax.nn.sigmoid(gates[:, 3 * H:4 * H])
            c = f * c + i * g
            h = o * jnp.tanh(c)
            outs.append(h)
        x = jnp.stack(outs, axis=1)
    y = jnp.tanh(x) @ params["w_lin"].T
    X = y.reshape(B, T, 2, output_dim, output_dim)
    return X[:, :, 0, :, :] + 1j * X[:, :, 1, :, :]


# ---------------------------------------------------------------------------
# Deterministic synthetic parameters (PyTorch-like uniform init)
# ---------------------------------------------------------------------------
def make_params(key, input_dim, output_dim, hidden_dim, n_layers):
    params = {}
    k = 1.0 / jnp.sqrt(hidden_dim)
    for l in range(n_layers):
        in_dim = (input_dim + 1) if l == 0 else hidden_dim
        key, k1, k2, k3, k4 = jax.random.split(key, 5)
        params[f"w_ih_{l}"] = jax.random.uniform(
            k1, (4 * hidden_dim, in_dim), jnp.float32, -k, k)
        params[f"w_hh_{l}"] = jax.random.uniform(
            k2, (4 * hidden_dim, hidden_dim), jnp.float32, -k, k)
        params[f"b_ih_{l}"] = jax.random.uniform(
            k3, (4 * hidden_dim,), jnp.float32, -k, k)
        params[f"b_hh_{l}"] = jax.random.uniform(
            k4, (4 * hidden_dim,), jnp.float32, -k, k)
    key, k5, k6 = jax.random.split(key, 3)
    params["w_lin"] = jax.random.uniform(
        k5, (2 * output_dim ** 2, hidden_dim), jnp.float32, -k, k)
    params["M"] = jax.random.uniform(k6, (1,), jnp.float32, -1.0, 1.0)
    return params


# ---------------------------------------------------------------------------
if __name__ == "__main__":
    INPUT_DIM = 3
    OUTPUT_DIM = 2
    HIDDEN_DIM = 32     # 4H = 128 -> gate pre-activations exactly one vreg wide
    N_LAYERS = 2
    BATCH = 2
    N_LAGS = 8

    key = jax.random.PRNGKey(0)
    key, pkey, xkey = jax.random.split(key, 3)
    params = make_params(pkey, INPUT_DIM, OUTPUT_DIM, HIDDEN_DIM, N_LAYERS)
    input_path = jax.random.normal(xkey, (BATCH, N_LAGS, INPUT_DIM), jnp.float32)

    # One-time weight prep: transpose, gate reorder, bias + M fusion, bf16.
    prep = prepare_params(params, input_dim=INPUT_DIM, hidden_dim=HIDDEN_DIM,
                          n_layers=N_LAYERS, output_dim=OUTPUT_DIM)

    out = lstm_regressor_with_h_forward(
        input_path, prep,
        input_dim=INPUT_DIM, output_dim=OUTPUT_DIM,
        hidden_dim=HIDDEN_DIM, n_layers=N_LAYERS)
    out = jax.block_until_ready(out)

    assert out.shape == (BATCH, N_LAGS, OUTPUT_DIM, OUTPUT_DIM)
    assert out.dtype == jnp.complex64

    # bf16 matmul operands (f32 accumulation) vs f32 reference -> loosened tol.
    ref = _reference_forward(input_path, params, N_LAYERS, OUTPUT_DIM)
    assert jnp.allclose(out, ref, atol=5e-2, rtol=5e-2), "mismatch vs reference"

    print("KERNEL_OK")
</pallas_src>

<mosaic_0001>
module attributes {stable_mosaic.version = 11 : i64} {
  func.func @kernel(%arg0: i32, %arg1: memref<1x64x8xbf16, #tpu.memory_space<vmem>>, %arg2: memref<8x128xbf16, #tpu.memory_space<vmem>>, %arg3: memref<32x128xbf16, #tpu.memory_space<vmem>>, %arg4: memref<1x128xf32, #tpu.memory_space<vmem>>, %arg5: memref<32x128xbf16, #tpu.memory_space<vmem>>, %arg6: memref<32x128xbf16, #tpu.memory_space<vmem>>, %arg7: memref<1x128xf32, #tpu.memory_space<vmem>>, %arg8: memref<32x8xbf16, #tpu.memory_space<vmem>>, %arg9: memref<1x64x8xf32, #tpu.memory_space<vmem>>, %arg10: memref<64x32xbf16, #tpu.memory_space<vmem>>, %arg11: memref<2x32x128xf32, #tpu.memory_space<vmem>>) attributes {dimension_semantics = [#tpu.dimension_semantics<parallel>], iteration_bounds = array<i64: 1>, scalar_prefetch = 0 : i64, scratch_operands = 2 : i64, tpu.core_type = #tpu.core_type<tc>, window_params = [{transform_indices = @transform_0, window_bounds = array<i64: 1, 64, 8>}, {pipeline_mode = #tpu.pipeline_mode<synchronous>, transform_indices = @transform_1, window_bounds = array<i64: 8, 128>}, {pipeline_mode = #tpu.pipeline_mode<synchronous>, transform_indices = @transform_2, window_bounds = array<i64: 32, 128>}, {pipeline_mode = #tpu.pipeline_mode<synchronous>, transform_indices = @transform_3, window_bounds = array<i64: 1, 128>}, {pipeline_mode = #tpu.pipeline_mode<synchronous>, transform_indices = @transform_4, window_bounds = array<i64: 32, 128>}, {pipeline_mode = #tpu.pipeline_mode<synchronous>, transform_indices = @transform_5, window_bounds = array<i64: 32, 128>}, {pipeline_mode = #tpu.pipeline_mode<synchronous>, transform_indices = @transform_6, window_bounds = array<i64: 1, 128>}, {pipeline_mode = #tpu.pipeline_mode<synchronous>, transform_indices = @transform_7, window_bounds = array<i64: 32, 8>}, {transform_indices = @transform_8, window_bounds = array<i64: 1, 64, 8>}]} {
    %c0 = arith.constant 0 : index
    %c0_0 = arith.constant 0 : index
    %0 = vector.load %arg2[%c0, %c0_0] : memref<8x128xbf16, #tpu.memory_space<vmem>>, vector<8x128xbf16>
    %c0_1 = arith.constant 0 : index
    %c0_2 = arith.constant 0 : index
    %1 = vector.load %arg3[%c0_1, %c0_2] : memref<32x128xbf16, #tpu.memory_space<vmem>>, vector<32x128xbf16>
    %c0_3 = arith.constant 0 : index
    %c0_4 = arith.constant 0 : index
    %2 = vector.load %arg4[%c0_3, %c0_4] : memref<1x128xf32, #tpu.memory_space<vmem>>, vector<1x128xf32>
    %c0_5 = arith.constant 0 : index
    %c0_6 = arith.constant 0 : index
    %c0_7 = arith.constant 0 : index
    %3 = vector.load %arg1[%c0_5, %c0_6, %c0_7] : memref<1x64x8xbf16, #tpu.memory_space<vmem>>, vector<1x32x8xbf16>
    %4 = vector.shape_cast %3 : vector<1x32x8xbf16> to vector<32x8xbf16>
    %cst = arith.constant dense<0.000000e+00> : vector<32x128xf32>
    %5 = tpu.matmul %4, %0, %cst {dimension_numbers = #tpu.dot_dimension_numbers<[1], [0], [0], [1], [0, 0, 1, 1], [], []>} : vector<32x8xbf16>, vector<8x128xbf16>, vector<32x128xf32> -> vector<32x128xf32>
    %6 = vector.broadcast %2 : vector<1x128xf32> to vector<32x128xf32>
    %7 = arith.addf %5, %6 : vector<32x128xf32>
    %c0_8 = arith.constant 0 : index
    %c0_9 = arith.constant 0 : index
    %c0_10 = arith.constant 0 : index
    %8 = vector.load %arg11[%c0_8, %c0_9, %c0_10] : memref<2x32x128xf32, #tpu.memory_space<vmem>>, vector<1x32x128xf32>
    %9 = vector.shape_cast %8 : vector<1x32x128xf32> to vector<32x128xf32>
    %10 = vector.shape_cast %7 : vector<32x128xf32> to vector<1x32x128xf32>
    tpu.vector_store %arg11[%c0_8, %c0_9, %c0_10], %10 {strides = array<i32>} : memref<2x32x128xf32, #tpu.memory_space<vmem>>, vector<1x32x128xf32>,
    %cst_11 = arith.constant 0.000000e+00 : f32
    %11 = vector.broadcast %cst_11 : f32 to vector<8x32xf32>
    %cst_12 = arith.constant 0.000000e+00 : f32
    %12 = vector.broadcast %cst_12 : f32 to vector<8x32xf32>
    %c0_13 = arith.constant 0 : index
    %c32 = arith.constant 32 : index
    %c0_14 = arith.constant 0 : index
    %13 = vector.load %arg1[%c0_13, %c32, %c0_14] : memref<1x64x8xbf16, #tpu.memory_space<vmem>>, vector<1x32x8xbf16>
    %14 = vector.shape_cast %13 : vector<1x32x8xbf16> to vector<32x8xbf16>
    %cst_15 = arith.constant dense<0.000000e+00> : vector<32x128xf32>
    %15 = tpu.matmul %14, %0, %cst_15 {dimension_numbers = #tpu.dot_dimension_numbers<[1], [0], [0], [1], [0, 0, 1, 1], [], []>} : vector<32x8xbf16>, vector<8x128xbf16>, vector<32x128xf32> -> vector<32x128xf32>
    %16 = vector.broadcast %2 : vector<1x128xf32> to vector<32x128xf32>
    %17 = arith.addf %15, %16 : vector<32x128xf32>
    %c1 = arith.constant 1 : index
    %c0_16 = arith.constant 0 : index
    %c0_17 = arith.constant 0 : index
    %18 = vector.load %arg11[%c1, %c0_16, %c0_17] : memref<2x32x128xf32, #tpu.memory_space<vmem>>, vector<1x32x128xf32>
    %19 = vector.shape_cast %18 : vector<1x32x128xf32> to vector<32x128xf32>
    %20 = vector.shape_cast %17 : vector<32x128xf32> to vector<1x32x128xf32>
    tpu.vector_store %arg11[%c1, %c0_16, %c0_17], %20 {strides = array<i32>} : memref<2x32x128xf32, #tpu.memory_space<vmem>>, vector<1x32x128xf32>,
    %c0_i32 = arith.constant 0 : i32
    %c8_i32 = arith.constant 8 : i32
    %21 = arith.muli %c0_i32, %c8_i32 : i32
    %22 = tpu.assume_multiple %21, 8 : i32
    %c0_18 = arith.constant 0 : index
    %23 = arith.index_cast %22 : i32 to index
    %c0_19 = arith.constant 0 : index
    %24 = vector.load %arg11[%c0_18, %23, %c0_19] : memref<2x32x128xf32, #tpu.memory_space<vmem>>, vector<1x8x128xf32>
    %25 = vector.shape_cast %24 : vector<1x8x128xf32> to vector<8x128xf32>
    %26 = arith.truncf %11 : vector<8x32xf32> to vector<8x32xbf16>
    %cst_20 = arith.constant dense<0.000000e+00> : vector<8x128xf32>
    %27 = tpu.matmul %26, %1, %cst_20 {dimension_numbers = #tpu.dot_dimension_numbers<[1], [0], [0], [1], [0, 0, 1, 1], [], []>} : vector<8x32xbf16>, vector<32x128xbf16>, vector<8x128xf32> -> vector<8x128xf32>
    %28 = arith.addf %25, %27 : vector<8x128xf32>
    %29 = vector.extract_strided_slice %28 {offsets = [0, 0], sizes = [8, 96], strides = [1, 1]} : vector<8x128xf32> to vector<8x96xf32>
    %30 = arith.negf %29 : vector<8x96xf32>
    %31 = math.exp %30 : vector<8x96xf32>
    %cst_21 = arith.constant 1.000000e+00 : f32
    %32 = vector.broadcast %cst_21 : f32 to vector<8x96xf32>
    %33 = arith.addf %32, %31 : vector<8x96xf32>
    %34 = arith.divf %32, %33 : vector<8x96xf32>
    %35 = vector.extract_strided_slice %28 {offsets = [0, 96], sizes = [8, 32], strides = [1, 1]} : vector<8x128xf32> to vector<8x32xf32>
    %36 = math.tanh %35 : vector<8x32xf32>
    %37 = vector.extract_strided_slice %34 {offsets = [0, 0], sizes = [8, 32], strides = [1, 1]} : vector<8x96xf32> to vector<8x32xf32>
    %38 = vector.extract_strided_slice %34 {offsets = [0, 32], sizes = [8, 32], strides = [1, 1]} : vector<8x96xf32> to vector<8x32xf32>
    %39 = vector.extract_strided_slice %34 {offsets = [0, 64], sizes = [8, 32], strides = [1, 1]} : vector<8x96xf32> to vector<8x32xf32>
    %40 = arith.mulf %38, %12 : vector<8x32xf32>
    %41 = arith.mulf %37, %36 : vector<8x32xf32>
    %42 = arith.addf %40, %41 : vector<8x32xf32>
    %43 = math.tanh %42 : vector<8x32xf32>
    %44 = arith.mulf %39, %43 : vector<8x32xf32>
    %c8_i32_22 = arith.constant 8 : i32
    %45 = arith.muli %c0_i32, %c8_i32_22 : i32
    %c0_i32_23 = arith.constant 0 : i32
    %46 = arith.addi %c0_i32_23, %45 : i32
    %47 = tpu.assume_multiple %46, 8 : i32
    %48 = arith.truncf %44 : vector<8x32xf32> to vector<8x32xbf16>
    %49 = arith.index_cast %47 : i32 to index
    %c0_24 = arith.constant 0 : index
    %50 = vector.load %arg10[%49, %c0_24] : memref<64x32xbf16, #tpu.memory_space<vmem>>, vector<8x32xbf16>
    tpu.vector_store %arg10[%49, %c0_24], %48 {strides = array<i32>} : memref<64x32xbf16, #tpu.memory_space<vmem>>, vector<8x32xbf16>,
    %c1_i32 = arith.constant 1 : i32
    %c8_i32_25 = arith.constant 8 : i32
    %51 = arith.muli %c1_i32, %c8_i32_25 : i32
    %52 = tpu.assume_multiple %51, 8 : i32
    %c0_26 = arith.constant 0 : index
    %53 = arith.index_cast %52 : i32 to index
    %c0_27 = arith.constant 0 : index
    %54 = vector.load %arg11[%c0_26, %53, %c0_27] : memref<2x32x128xf32, #tpu.memory_space<vmem>>, vector<1x8x128xf32>
    %55 = vector.shape_cast %54 : vector<1x8x128xf32> to vector<8x128xf32>
    %56 = arith.truncf %44 : vector<8x32xf32> to vector<8x32xbf16>
    %cst_28 = arith.constant dense<0.000000e+00> : vector<8x128xf32>
    %57 = tpu.matmul %56, %1, %cst_28 {dimension_numbers = #tpu.dot_dimension_numbers<[1], [0], [0], [1], [0, 0, 1, 1], [], []>} : vector<8x32xbf16>, vector<32x128xbf16>, vector<8x128xf32> -> vector<8x128xf32>
    %58 = arith.addf %55, %57 : vector<8x128xf32>
    %59 = vector.extract_strided_slice %58 {offsets = [0, 0], sizes = [8, 96], strides = [1, 1]} : vector<8x128xf32> to vector<8x96xf32>
    %60 = arith.negf %59 : vector<8x96xf32>
    %61 = math.exp %60 : vector<8x96xf32>
    %cst_29 = arith.constant 1.000000e+00 : f32
    %62 = vector.broadcast %cst_29 : f32 to vector<8x96xf32>
    %63 = arith.addf %62, %61 : vector<8x96xf32>
    %64 = arith.divf %62, %63 : vector<8x96xf32>
    %65 = vector.extract_strided_slice %58 {offsets = [0, 96], sizes = [8, 32], strides = [1, 1]} : vector<8x128xf32> to vector<8x32xf32>
    %66 = math.tanh %65 : vector<8x32xf32>
    %67 = vector.extract_strided_slice %64 {offsets = [0, 0], sizes = [8, 32], strides = [1, 1]} : vector<8x96xf32> to vector<8x32xf32>
    %68 = vector.extract_strided_slice %64 {offsets = [0, 32], sizes = [8, 32], strides = [1, 1]} : vector<8x96xf32> to vector<8x32xf32>
    %69 = vector.extract_strided_slice %64 {offsets = [0, 64], sizes = [8, 32], strides = [1, 1]} : vector<8x96xf32> to vector<8x32xf32>
    %70 = arith.mulf %68, %42 : vector<8x32xf32>
    %71 = arith.mulf %67, %66 : vector<8x32xf32>
    %72 = arith.addf %70, %71 : vector<8x32xf32>
    %73 = math.tanh %72 : vector<8x32xf32>
    %74 = arith.mulf %69, %73 : vector<8x32xf32>
    %c8_i32_30 = arith.constant 8 : i32
    %75 = arith.muli %c1_i32, %c8_i32_30 : i32
    %c0_i32_31 = arith.constant 0 : i32
    %76 = arith.addi %c0_i32_31, %75 : i32
    %77 = tpu.assume_multiple %76, 8 : i32
    %78 = arith.truncf %74 : vector<8x32xf32> to vector<8x32xbf16>
    %79 = arith.index_cast %77 : i32 to index
    %c0_32 = arith.constant 0 : index
    %80 = vector.load %arg10[%79, %c0_32] : memref<64x32xbf16, #tpu.memory_space<vmem>>, vector<8x32xbf16>
    tpu.vector_store %arg10[%79, %c0_32], %78 {strides = array<i32>} : memref<64x32xbf16, #tpu.memory_space<vmem>>, vector<8x32xbf16>,
    %c2_i32 = arith.constant 2 : i32
    %c8_i32_33 = arith.constant 8 : i32
    %81 = arith.muli %c2_i32, %c8_i32_33 : i32
    %82 = tpu.assume_multiple %81, 8 : i32
    %c0_34 = arith.constant 0 : index
    %83 = arith.index_cast %82 : i32 to index
    %c0_35 = arith.constant 0 : index
    %84 = vector.load %arg11[%c0_34, %83, %c0_35] : memref<2x32x128xf32, #tpu.memory_space<vmem>>, vector<1x8x128xf32>
    %85 = vector.shape_cast %84 : vector<1x8x128xf32> to vector<8x128xf32>
    %86 = arith.truncf %74 : vector<8x32xf32> to vector<8x32xbf16>
    %cst_36 = arith.constant dense<0.000000e+00> : vector<8x128xf32>
    %87 = tpu.matmul %86, %1, %cst_36 {dimension_numbers = #tpu.dot_dimension_numbers<[1], [0], [0], [1], [0, 0, 1, 1], [], []>} : vector<8x32xbf16>, vector<32x128xbf16>, vector<8x128xf32> -> vector<8x128xf32>
    %88 = arith.addf %85, %87 : vector<8x128xf32>
    %89 = vector.extract_strided_slice %88 {offsets = [0, 0], sizes = [8, 96], strides = [1, 1]} : vector<8x128xf32> to vector<8x96xf32>
    %90 = arith.negf %89 : vector<8x96xf32>
    %91 = math.exp %90 : vector<8x96xf32>
    %cst_37 = arith.constant 1.000000e+00 : f32
    %92 = vector.broadcast %cst_37 : f32 to vector<8x96xf32>
    %93 = arith.addf %92, %91 : vector<8x96xf32>
    %94 = arith.divf %92, %93 : vector<8x96xf32>
    %95 = vector.extract_strided_slice %88 {offsets = [0, 96], sizes = [8, 32], strides = [1, 1]} : vector<8x128xf32> to vector<8x32xf32>
    %96 = math.tanh %95 : vector<8x32xf32>
    %97 = vector.extract_strided_slice %94 {offsets = [0, 0], sizes = [8, 32], strides = [1, 1]} : vector<8x96xf32> to vector<8x32xf32>
    %98 = vector.extract_strided_slice %94 {offsets = [0, 32], sizes = [8, 32], strides = [1, 1]} : vector<8x96xf32> to vector<8x32xf32>
    %99 = vector.extract_strided_slice %94 {offsets = [0, 64], sizes = [8, 32], strides = [1, 1]} : vector<8x96xf32> to vector<8x32xf32>
    %100 = arith.mulf %98, %72 : vector<8x32xf32>
    %101 = arith.mulf %97, %96 : vector<8x32xf32>
    %102 = arith.addf %100, %101 : vector<8x32xf32>
    %103 = math.tanh %102 : vector<8x32xf32>
    %104 = arith.mulf %99, %103 : vector<8x32xf32>
    %c8_i32_38 = arith.constant 8 : i32
    %105 = arith.muli %c2_i32, %c8_i32_38 : i32
    %c0_i32_39 = arith.constant 0 : i32
    %106 = arith.addi %c0_i32_39, %105 : i32
    %107 = tpu.assume_multiple %106, 8 : i32
    %108 = arith.truncf %104 : vector<8x32xf32> to vector<8x32xbf16>
    %109 = arith.index_cast %107 : i32 to index
    %c0_40 = arith.constant 0 : index
    %110 = vector.load %arg10[%109, %c0_40] : memref<64x32xbf16, #tpu.memory_space<vmem>>, vector<8x32xbf16>
    tpu.vector_store %arg10[%109, %c0_40], %108 {strides = array<i32>} : memref<64x32xbf16, #tpu.memory_space<vmem>>, vector<8x32xbf16>,
    %c3_i32 = arith.constant 3 : i32
    %c8_i32_41 = arith.constant 8 : i32
    %111 = arith.muli %c3_i32, %c8_i32_41 : i32
    %112 = tpu.assume_multiple %111, 8 : i32
    %c0_42 = arith.constant 0 : index
    %113 = arith.index_cast %112 : i32 to index
    %c0_43 = arith.constant 0 : index
    %114 = vector.load %arg11[%c0_42, %113, %c0_43] : memref<2x32x128xf32, #tpu.memory_space<vmem>>, vector<1x8x128xf32>
    %115 = vector.shape_cast %114 : vector<1x8x128xf32> to vector<8x128xf32>
    %116 = arith.truncf %104 : vector<8x32xf32> to vector<8x32xbf16>
    %cst_44 = arith.constant dense<0.000000e+00> : vector<8x128xf32>
    %117 = tpu.matmul %116, %1, %cst_44 {dimension_numbers = #tpu.dot_dimension_numbers<[1], [0], [0], [1], [0, 0, 1, 1], [], []>} : vector<8x32xbf16>, vector<32x128xbf16>, vector<8x128xf32> -> vector<8x128xf32>
    %118 = arith.addf %115, %117 : vector<8x128xf32>
    %119 = vector.extract_strided_slice %118 {offsets = [0, 0], sizes = [8, 96], strides = [1, 1]} : vector<8x128xf32> to vector<8x96xf32>
    %120 = arith.negf %119 : vector<8x96xf32>
    %121 = math.exp %120 : vector<8x96xf32>
    %cst_45 = arith.constant 1.000000e+00 : f32
    %122 = vector.broadcast %cst_45 : f32 to vector<8x96xf32>
    %123 = arith.addf %122, %121 : vector<8x96xf32>
    %124 = arith.divf %122, %123 : vector<8x96xf32>
    %125 = vector.extract_strided_slice %118 {offsets = [0, 96], sizes = [8, 32], strides = [1, 1]} : vector<8x128xf32> to vector<8x32xf32>
    %126 = math.tanh %125 : vector<8x32xf32>
    %127 = vector.extract_strided_slice %124 {offsets = [0, 0], sizes = [8, 32], strides = [1, 1]} : vector<8x96xf32> to vector<8x32xf32>
    %128 = vector.extract_strided_slice %124 {offsets = [0, 32], sizes = [8, 32], strides = [1, 1]} : vector<8x96xf32> to vector<8x32xf32>
    %129 = vector.extract_strided_slice %124 {offsets = [0, 64], sizes = [8, 32], strides = [1, 1]} : vector<8x96xf32> to vector<8x32xf32>
    %130 = arith.mulf %128, %102 : vector<8x32xf32>
    %131 = arith.mulf %127, %126 : vector<8x32xf32>
    %132 = arith.addf %130, %131 : vector<8x32xf32>
    %133 = math.tanh %132 : vector<8x32xf32>
    %134 = arith.mulf %129, %133 : vector<8x32xf32>
    %c8_i32_46 = arith.constant 8 : i32
    %135 = arith.muli %c3_i32, %c8_i32_46 : i32
    %c0_i32_47 = arith.constant 0 : i32
    %136 = arith.addi %c0_i32_47, %135 : i32
    %137 = tpu.assume_multiple %136, 8 : i32
    %138 = arith.truncf %134 : vector<8x32xf32> to vector<8x32xbf16>
    %139 = arith.index_cast %137 : i32 to index
    %c0_48 = arith.constant 0 : index
    %140 = vector.load %arg10[%139, %c0_48] : memref<64x32xbf16, #tpu.memory_space<vmem>>, vector<8x32xbf16>
    tpu.vector_store %arg10[%139, %c0_48], %138 {strides = array<i32>} : memref<64x32xbf16, #tpu.memory_space<vmem>>, vector<8x32xbf16>,
    %c4_i32 = arith.constant 4 : i32
    %c0_i32_49 = arith.constant 0 : i32
    %c8_i32_50 = arith.constant 8 : i32
    %141 = arith.muli %c0_i32_49, %c8_i32_50 : i32
    %142 = tpu.assume_multiple %141, 8 : i32
    %c1_51 = arith.constant 1 : index
    %143 = arith.index_cast %142 : i32 to index
    %c0_52 = arith.constant 0 : index
    %144 = vector.load %arg11[%c1_51, %143, %c0_52] : memref<2x32x128xf32, #tpu.memory_space<vmem>>, vector<1x8x128xf32>
    %145 = vector.shape_cast %144 : vector<1x8x128xf32> to vector<8x128xf32>
    %146 = arith.truncf %134 : vector<8x32xf32> to vector<8x32xbf16>
    %cst_53 = arith.constant dense<0.000000e+00> : vector<8x128xf32>
    %147 = tpu.matmul %146, %1, %cst_53 {dimension_numbers = #tpu.dot_dimension_numbers<[1], [0], [0], [1], [0, 0, 1, 1], [], []>} : vector<8x32xbf16>, vector<32x128xbf16>, vector<8x128xf32> -> vector<8x128xf32>
    %148 = arith.addf %145, %147 : vector<8x128xf32>
    %149 = vector.extract_strided_slice %148 {offsets = [0, 0], sizes = [8, 96], strides = [1, 1]} : vector<8x128xf32> to vector<8x96xf32>
    %150 = arith.negf %149 : vector<8x96xf32>
    %151 = math.exp %150 : vector<8x96xf32>
    %cst_54 = arith.constant 1.000000e+00 : f32
    %152 = vector.broadcast %cst_54 : f32 to vector<8x96xf32>
    %153 = arith.addf %152, %151 : vector<8x96xf32>
    %154 = arith.divf %152, %153 : vector<8x96xf32>
    %155 = vector.extract_strided_slice %148 {offsets = [0, 96], sizes = [8, 32], strides = [1, 1]} : vector<8x128xf32> to vector<8x32xf32>
    %156 = math.tanh %155 : vector<8x32xf32>
    %157 = vector.extract_strided_slice %154 {offsets = [0, 0], sizes = [8, 32], strides = [1, 1]} : vector<8x96xf32> to vector<8x32xf32>
    %158 = vector.extract_strided_slice %154 {offsets = [0, 32], sizes = [8, 32], strides = [1, 1]} : vector<8x96xf32> to vector<8x32xf32>
    %159 = vector.extract_strided_slice %154 {offsets = [0, 64], sizes = [8, 32], strides = [1, 1]} : vector<8x96xf32> to vector<8x32xf32>
    %160 = arith.mulf %158, %132 : vector<8x32xf32>
    %161 = arith.mulf %157, %156 : vector<8x32xf32>
    %162 = arith.addf %160, %161 : vector<8x32xf32>
    %163 = math.tanh %162 : vector<8x32xf32>
    %164 = arith.mulf %159, %163 : vector<8x32xf32>
    %c8_i32_55 = arith.constant 8 : i32
    %165 = arith.muli %c0_i32_49, %c8_i32_55 : i32
    %c32_i32 = arith.constant 32 : i32
    %166 = arith.addi %c32_i32, %165 : i32
    %167 = tpu.assume_multiple %166, 8 : i32
    %168 = arith.truncf %164 : vector<8x32xf32> to vector<8x32xbf16>
    %169 = arith.index_cast %167 : i32 to index
    %c0_56 = arith.constant 0 : index
    %170 = vector.load %arg10[%169, %c0_56] : memref<64x32xbf16, #tpu.memory_space<vmem>>, vector<8x32xbf16>
    tpu.vector_store %arg10[%169, %c0_56], %168 {strides = array<i32>} : memref<64x32xbf16, #tpu.memory_space<vmem>>, vector<8x32xbf16>,
    %c1_i32_57 = arith.constant 1 : i32
    %c8_i32_58 = arith.constant 8 : i32
    %171 = arith.muli %c1_i32_57, %c8_i32_58 : i32
    %172 = tpu.assume_multiple %171, 8 : i32
    %c1_59 = arith.constant 1 : index
    %173 = arith.index_cast %172 : i32 to index
    %c0_60 = arith.constant 0 : index
    %174 = vector.load %arg11[%c1_59, %173, %c0_60] : memref<2x32x128xf32, #tpu.memory_space<vmem>>, vector<1x8x128xf32>
    %175 = vector.shape_cast %174 : vector<1x8x128xf32> to vector<8x128xf32>
    %176 = arith.truncf %164 : vector<8x32xf32> to vector<8x32xbf16>
    %cst_61 = arith.constant dense<0.000000e+00> : vector<8x128xf32>
    %177 = tpu.matmul %176, %1, %cst_61 {dimension_numbers = #tpu.dot_dimension_numbers<[1], [0], [0], [1], [0, 0, 1, 1], [], []>} : vector<8x32xbf16>, vector<32x128xbf16>, vector<8x128xf32> -> vector<8x128xf32>
    %178 = arith.addf %175, %177 : vector<8x128xf32>
    %179 = vector.extract_strided_slice %178 {offsets = [0, 0], sizes = [8, 96], strides = [1, 1]} : vector<8x128xf32> to vector<8x96xf32>
    %180 = arith.negf %179 : vector<8x96xf32>
    %181 = math.exp %180 : vector<8x96xf32>
    %cst_62 = arith.constant 1.000000e+00 : f32
    %182 = vector.broadcast %cst_62 : f32 to vector<8x96xf32>
    %183 = arith.addf %182, %181 : vector<8x96xf32>
    %184 = arith.divf %182, %183 : vector<8x96xf32>
    %185 = vector.extract_strided_slice %178 {offsets = [0, 96], sizes = [8, 32], strides = [1, 1]} : vector<8x128xf32> to vector<8x32xf32>
    %186 = math.tanh %185 : vector<8x32xf32>
    %187 = vector.extract_strided_slice %184 {offsets = [0, 0], sizes = [8, 32], strides = [1, 1]} : vector<8x96xf32> to vector<8x32xf32>
    %188 = vector.extract_strided_slice %184 {offsets = [0, 32], sizes = [8, 32], strides = [1, 1]} : vector<8x96xf32> to vector<8x32xf32>
    %189 = vector.extract_strided_slice %184 {offsets = [0, 64], sizes = [8, 32], strides = [1, 1]} : vector<8x96xf32> to vector<8x32xf32>
    %190 = arith.mulf %188, %162 : vector<8x32xf32>
    %191 = arith.mulf %187, %186 : vector<8x32xf32>
    %192 = arith.addf %190, %191 : vector<8x32xf32>
    %193 = math.tanh %192 : vector<8x32xf32>
    %194 = arith.mulf %189, %193 : vector<8x32xf32>
    %c8_i32_63 = arith.constant 8 : i32
    %195 = arith.muli %c1_i32_57, %c8_i32_63 : i32
    %c32_i32_64 = arith.constant 32 : i32
    %196 = arith.addi %c32_i32_64, %195 : i32
    %197 = tpu.assume_multiple %196, 8 : i32
    %198 = arith.truncf %194 : vector<8x32xf32> to vector<8x32xbf16>
    %199 = arith.index_cast %197 : i32 to index
    %c0_65 = arith.constant 0 : index
    %200 = vector.load %arg10[%199, %c0_65] : memref<64x32xbf16, #tpu.memory_space<vmem>>, vector<8x32xbf16>
    tpu.vector_store %arg10[%199, %c0_65], %198 {strides = array<i32>} : memref<64x32xbf16, #tpu.memory_space<vmem>>, vector<8x32xbf16>,
    %c2_i32_66 = arith.constant 2 : i32
    %c8_i32_67 = arith.constant 8 : i32
    %201 = arith.muli %c2_i32_66, %c8_i32_67 : i32
    %202 = tpu.assume_multiple %201, 8 : i32
    %c1_68 = arith.constant 1 : index
    %203 = arith.index_cast %202 : i32 to index
    %c0_69 = arith.constant 0 : index
    %204 = vector.load %arg11[%c1_68, %203, %c0_69] : memref<2x32x128xf32, #tpu.memory_space<vmem>>, vector<1x8x128xf32>
    %205 = vector.shape_cast %204 : vector<1x8x128xf32> to vector<8x128xf32>
    %206 = arith.truncf %194 : vector<8x32xf32> to vector<8x32xbf16>
    %cst_70 = arith.constant dense<0.000000e+00> : vector<8x128xf32>
    %207 = tpu.matmul %206, %1, %cst_70 {dimension_numbers = #tpu.dot_dimension_numbers<[1], [0], [0], [1], [0, 0, 1, 1], [], []>} : vector<8x32xbf16>, vector<32x128xbf16>, vector<8x128xf32> -> vector<8x128xf32>
    %208 = arith.addf %205, %207 : vector<8x128xf32>
    %209 = vector.extract_strided_slice %208 {offsets = [0, 0], sizes = [8, 96], strides = [1, 1]} : vector<8x128xf32> to vector<8x96xf32>
    %210 = arith.negf %209 : vector<8x96xf32>
    %211 = math.exp %210 : vector<8x96xf32>
    %cst_71 = arith.constant 1.000000e+00 : f32
    %212 = vector.broadcast %cst_71 : f32 to vector<8x96xf32>
    %213 = arith.addf %212, %211 : vector<8x96xf32>
    %214 = arith.divf %212, %213 : vector<8x96xf32>
    %215 = vector.extract_strided_slice %208 {offsets = [0, 96], sizes = [8, 32], strides = [1, 1]} : vector<8x128xf32> to vector<8x32xf32>
    %216 = math.tanh %215 : vector<8x32xf32>
    %217 = vector.extract_strided_slice %214 {offsets = [0, 0], sizes = [8, 32], strides = [1, 1]} : vector<8x96xf32> to vector<8x32xf32>
    %218 = vector.extract_strided_slice %214 {offsets = [0, 32], sizes = [8, 32], strides = [1, 1]} : vector<8x96xf32> to vector<8x32xf32>
    %219 = vector.extract_strided_slice %214 {offsets = [0, 64], sizes = [8, 32], strides = [1, 1]} : vector<8x96xf32> to vector<8x32xf32>
    %220 = arith.mulf %218, %192 : vector<8x32xf32>
    %221 = arith.mulf %217, %216 : vector<8x32xf32>
    %222 = arith.addf %220, %221 : vector<8x32xf32>
    %223 = math.tanh %222 : vector<8x32xf32>
    %224 = arith.mulf %219, %223 : vector<8x32xf32>
    %c8_i32_72 = arith.constant 8 : i32
    %225 = arith.muli %c2_i32_66, %c8_i32_72 : i32
    %c32_i32_73 = arith.constant 32 : i32
    %226 = arith.addi %c32_i32_73, %225 : i32
    %227 = tpu.assume_multiple %226, 8 : i32
    %228 = arith.truncf %224 : vector<8x32xf32> to vector<8x32xbf16>
    %229 = arith.index_cast %227 : i32 to index
    %c0_74 = arith.constant 0 : index
    %230 = vector.load %arg10[%229, %c0_74] : memref<64x32xbf16, #tpu.memory_space<vmem>>, vector<8x32xbf16>
    tpu.vector_store %arg10[%229, %c0_74], %228 {strides = array<i32>} : memref<64x32xbf16, #tpu.memory_space<vmem>>, vector<8x32xbf16>,
    %c3_i32_75 = arith.constant 3 : i32
    %c8_i32_76 = arith.constant 8 : i32
    %231 = arith.muli %c3_i32_75, %c8_i32_76 : i32
    %232 = tpu.assume_multiple %231, 8 : i32
    %c1_77 = arith.constant 1 : index
    %233 = arith.index_cast %232 : i32 to index
    %c0_78 = arith.constant 0 : index
    %234 = vector.load %arg11[%c1_77, %233, %c0_78] : memref<2x32x128xf32, #tpu.memory_space<vmem>>, vector<1x8x128xf32>
    %235 = vector.shape_cast %234 : vector<1x8x128xf32> to vector<8x128xf32>
    %236 = arith.truncf %224 : vector<8x32xf32> to vector<8x32xbf16>
    %cst_79 = arith.constant dense<0.000000e+00> : vector<8x128xf32>
    %237 = tpu.matmul %236, %1, %cst_79 {dimension_numbers = #tpu.dot_dimension_numbers<[1], [0], [0], [1], [0, 0, 1, 1], [], []>} : vector<8x32xbf16>, vector<32x128xbf16>, vector<8x128xf32> -> vector<8x128xf32>
    %238 = arith.addf %235, %237 : vector<8x128xf32>
    %239 = vector.extract_strided_slice %238 {offsets = [0, 0], sizes = [8, 96], strides = [1, 1]} : vector<8x128xf32> to vector<8x96xf32>
    %240 = arith.negf %239 : vector<8x96xf32>
    %241 = math.exp %240 : vector<8x96xf32>
    %cst_80 = arith.constant 1.000000e+00 : f32
    %242 = vector.broadcast %cst_80 : f32 to vector<8x96xf32>
    %243 = arith.addf %242, %241 : vector<8x96xf32>
    %244 = arith.divf %242, %243 : vector<8x96xf32>
    %245 = vector.extract_strided_slice %238 {offsets = [0, 96], sizes = [8, 32], strides = [1, 1]} : vector<8x128xf32> to vector<8x32xf32>
    %246 = math.tanh %245 : vector<8x32xf32>
    %247 = vector.extract_strided_slice %244 {offsets = [0, 0], sizes = [8, 32], strides = [1, 1]} : vector<8x96xf32> to vector<8x32xf32>
    %248 = vector.extract_strided_slice %244 {offsets = [0, 32], sizes = [8, 32], strides = [1, 1]} : vector<8x96xf32> to vector<8x32xf32>
    %249 = vector.extract_strided_slice %244 {offsets = [0, 64], sizes = [8, 32], strides = [1, 1]} : vector<8x96xf32> to vector<8x32xf32>
    %250 = arith.mulf %248, %222 : vector<8x32xf32>
    %251 = arith.mulf %247, %246 : vector<8x32xf32>
    %252 = arith.addf %250, %251 : vector<8x32xf32>
    %253 = math.tanh %252 : vector<8x32xf32>
    %254 = arith.mulf %249, %253 : vector<8x32xf32>
    %c8_i32_81 = arith.constant 8 : i32
    %255 = arith.muli %c3_i32_75, %c8_i32_81 : i32
    %c32_i32_82 = arith.constant 32 : i32
    %256 = arith.addi %c32_i32_82, %255 : i32
    %257 = tpu.assume_multiple %256, 8 : i32
    %258 = arith.truncf %254 : vector<8x32xf32> to vector<8x32xbf16>
    %259 = arith.index_cast %257 : i32 to index
    %c0_83 = arith.constant 0 : index
    %260 = vector.load %arg10[%259, %c0_83] : memref<64x32xbf16, #tpu.memory_space<vmem>>, vector<8x32xbf16>
    tpu.vector_store %arg10[%259, %c0_83], %258 {strides = array<i32>} : memref<64x32xbf16, #tpu.memory_space<vmem>>, vector<8x32xbf16>,
    %c4_i32_84 = arith.constant 4 : i32
    %c0_85 = arith.constant 0 : index
    %c0_86 = arith.constant 0 : index
    %261 = vector.load %arg5[%c0_85, %c0_86] : memref<32x128xbf16, #tpu.memory_space<vmem>>, vector<32x128xbf16>
    %c0_87 = arith.constant 0 : index
    %c0_88 = arith.constant 0 : index
    %262 = vector.load %arg6[%c0_87, %c0_88] : memref<32x128xbf16, #tpu.memory_space<vmem>>, vector<32x128xbf16>
    %c0_89 = arith.constant 0 : index
    %c0_90 = arith.constant 0 : index
    %263 = vector.load %arg7[%c0_89, %c0_90] : memref<1x128xf32, #tpu.memory_space<vmem>>, vector<1x128xf32>
    %c0_91 = arith.constant 0 : index
    %c0_92 = arith.constant 0 : index
    %264 = vector.load %arg10[%c0_91, %c0_92] : memref<64x32xbf16, #tpu.memory_space<vmem>>, vector<32x32xbf16>
    %cst_93 = arith.constant dense<0.000000e+00> : vector<32x128xf32>
    %265 = tpu.matmul %264, %261, %cst_93 {dimension_numbers = #tpu.dot_dimension_numbers<[1], [0], [0], [1], [0, 0, 1, 1], [], []>} : vector<32x32xbf16>, vector<32x128xbf16>, vector<32x128xf32> -> vector<32x128xf32>
    %266 = vector.broadcast %263 : vector<1x128xf32> to vector<32x128xf32>
    %267 = arith.addf %265, %266 : vector<32x128xf32>
    %c0_94 = arith.constant 0 : index
    %c0_95 = arith.constant 0 : index
    %c0_96 = arith.constant 0 : index
    %268 = vector.load %arg11[%c0_94, %c0_95, %c0_96] : memref<2x32x128xf32, #tpu.memory_space<vmem>>, vector<1x32x128xf32>
    %269 = vector.shape_cast %268 : vector<1x32x128xf32> to vector<32x128xf32>
    %270 = vector.shape_cast %267 : vector<32x128xf32> to vector<1x32x128xf32>
    tpu.vector_store %arg11[%c0_94, %c0_95, %c0_96], %270 {strides = array<i32>} : memref<2x32x128xf32, #tpu.memory_space<vmem>>, vector<1x32x128xf32>,
    %cst_97 = arith.constant 0.000000e+00 : f32
    %271 = vector.broadcast %cst_97 : f32 to vector<8x32xf32>
    %cst_98 = arith.constant 0.000000e+00 : f32
    %272 = vector.broadcast %cst_98 : f32 to vector<8x32xf32>
    %c32_99 = arith.constant 32 : index
    %c0_100 = arith.constant 0 : index
    %273 = vector.load %arg10[%c32_99, %c0_100] : memref<64x32xbf16, #tpu.memory_space<vmem>>, vector<32x32xbf16>
    %cst_101 = arith.constant dense<0.000000e+00> : vector<32x128xf32>
    %274 = tpu.matmul %273, %261, %cst_101 {dimension_numbers = #tpu.dot_dimension_numbers<[1], [0], [0], [1], [0, 0, 1, 1], [], []>} : vector<32x32xbf16>, vector<32x128xbf16>, vector<32x128xf32> -> vector<32x128xf32>
    %275 = vector.broadcast %263 : vector<1x128xf32> to vector<32x128xf32>
    %276 = arith.addf %274, %275 : vector<32x128xf32>
    %c1_102 = arith.constant 1 : index
    %c0_103 = arith.constant 0 : index
    %c0_104 = arith.constant 0 : index
    %277 = vector.load %arg11[%c1_102, %c0_103, %c0_104] : memref<2x32x128xf32, #tpu.memory_space<vmem>>, vector<1x32x128xf32>
    %278 = vector.shape_cast %277 : vector<1x32x128xf32> to vector<32x128xf32>
    %279 = vector.shape_cast %276 : vector<32x128xf32> to vector<1x32x128xf32>
    tpu.vector_store %arg11[%c1_102, %c0_103, %c0_104], %279 {strides = array<i32>} : memref<2x32x128xf32, #tpu.memory_space<vmem>>, vector<1x32x128xf32>,
    %c0_i32_105 = arith.constant 0 : i32
    %c8_i32_106 = arith.constant 8 : i32
    %280 = arith.muli %c0_i32_105, %c8_i32_106 : i32
    %281 = tpu.assume_multiple %280, 8 : i32
    %c0_107 = arith.constant 0 : index
    %282 = arith.index_cast %281 : i32 to index
    %c0_108 = arith.constant 0 : index
    %283 = vector.load %arg11[%c0_107, %282, %c0_108] : memref<2x32x128xf32, #tpu.memory_space<vmem>>, vector<1x8x128xf32>
    %284 = vector.shape_cast %283 : vector<1x8x128xf32> to vector<8x128xf32>
    %285 = arith.truncf %271 : vector<8x32xf32> to vector<8x32xbf16>
    %cst_109 = arith.constant dense<0.000000e+00> : vector<8x128xf32>
    %286 = tpu.matmul %285, %262, %cst_109 {dimension_numbers = #tpu.dot_dimension_numbers<[1], [0], [0], [1], [0, 0, 1, 1], [], []>} : vector<8x32xbf16>, vector<32x128xbf16>, vector<8x128xf32> -> vector<8x128xf32>
    %287 = arith.addf %284, %286 : vector<8x128xf32>
    %288 = vector.extract_strided_slice %287 {offsets = [0, 0], sizes = [8, 96], strides = [1, 1]} : vector<8x128xf32> to vector<8x96xf32>
    %289 = arith.negf %288 : vector<8x96xf32>
    %290 = math.exp %289 : vector<8x96xf32>
    %cst_110 = arith.constant 1.000000e+00 : f32
    %291 = vector.broadcast %cst_110 : f32 to vector<8x96xf32>
    %292 = arith.addf %291, %290 : vector<8x96xf32>
    %293 = arith.divf %291, %292 : vector<8x96xf32>
    %294 = vector.extract_strided_slice %287 {offsets = [0, 96], sizes = [8, 32], strides = [1, 1]} : vector<8x128xf32> to vector<8x32xf32>
    %295 = math.tanh %294 : vector<8x32xf32>
    %296 = vector.extract_strided_slice %293 {offsets = [0, 0], sizes = [8, 32], strides = [1, 1]} : vector<8x96xf32> to vector<8x32xf32>
    %297 = vector.extract_strided_slice %293 {offsets = [0, 32], sizes = [8, 32], strides = [1, 1]} : vector<8x96xf32> to vector<8x32xf32>
    %298 = vector.extract_strided_slice %293 {offsets = [0, 64], sizes = [8, 32], strides = [1, 1]} : vector<8x96xf32> to vector<8x32xf32>
    %299 = arith.mulf %297, %272 : vector<8x32xf32>
    %300 = arith.mulf %296, %295 : vector<8x32xf32>
    %301 = arith.addf %299, %300 : vector<8x32xf32>
    %302 = math.tanh %301 : vector<8x32xf32>
    %303 = arith.mulf %298, %302 : vector<8x32xf32>
    %c8_i32_111 = arith.constant 8 : i32
    %304 = arith.muli %c0_i32_105, %c8_i32_111 : i32
    %c0_i32_112 = arith.constant 0 : i32
    %305 = arith.addi %c0_i32_112, %304 : i32
    %306 = tpu.assume_multiple %305, 8 : i32
    %307 = arith.truncf %303 : vector<8x32xf32> to vector<8x32xbf16>
    %308 = arith.index_cast %306 : i32 to index
    %c0_113 = arith.constant 0 : index
    %309 = vector.load %arg10[%308, %c0_113] : memref<64x32xbf16, #tpu.memory_space<vmem>>, vector<8x32xbf16>
    tpu.vector_store %arg10[%308, %c0_113], %307 {strides = array<i32>} : memref<64x32xbf16, #tpu.memory_space<vmem>>, vector<8x32xbf16>,
    %c1_i32_114 = arith.constant 1 : i32
    %c8_i32_115 = arith.constant 8 : i32
    %310 = arith.muli %c1_i32_114, %c8_i32_115 : i32
    %311 = tpu.assume_multiple %310, 8 : i32
    %c0_116 = arith.constant 0 : index
    %312 = arith.index_cast %311 : i32 to index
    %c0_117 = arith.constant 0 : index
    %313 = vector.load %arg11[%c0_116, %312, %c0_117] : memref<2x32x128xf32, #tpu.memory_space<vmem>>, vector<1x8x128xf32>
    %314 = vector.shape_cast %313 : vector<1x8x128xf32> to vector<8x128xf32>
    %315 = arith.truncf %303 : vector<8x32xf32> to vector<8x32xbf16>
    %cst_118 = arith.constant dense<0.000000e+00> : vector<8x128xf32>
    %316 = tpu.matmul %315, %262, %cst_118 {dimension_numbers = #tpu.dot_dimension_numbers<[1], [0], [0], [1], [0, 0, 1, 1], [], []>} : vector<8x32xbf16>, vector<32x128xbf16>, vector<8x128xf32> -> vector<8x128xf32>
    %317 = arith.addf %314, %316 : vector<8x128xf32>
    %318 = vector.extract_strided_slice %317 {offsets = [0, 0], sizes = [8, 96], strides = [1, 1]} : vector<8x128xf32> to vector<8x96xf32>
    %319 = arith.negf %318 : vector<8x96xf32>
    %320 = math.exp %319 : vector<8x96xf32>
    %cst_119 = arith.constant 1.000000e+00 : f32
    %321 = vector.broadcast %cst_119 : f32 to vector<8x96xf32>
    %322 = arith.addf %321, %320 : vector<8x96xf32>
    %323 = arith.divf %321, %322 : vector<8x96xf32>
    %324 = vector.extract_strided_slice %317 {offsets = [0, 96], sizes = [8, 32], strides = [1, 1]} : vector<8x128xf32> to vector<8x32xf32>
    %325 = math.tanh %324 : vector<8x32xf32>
    %326 = vector.extract_strided_slice %323 {offsets = [0, 0], sizes = [8, 32], strides = [1, 1]} : vector<8x96xf32> to vector<8x32xf32>
    %327 = vector.extract_strided_slice %323 {offsets = [0, 32], sizes = [8, 32], strides = [1, 1]} : vector<8x96xf32> to vector<8x32xf32>
    %328 = vector.extract_strided_slice %323 {offsets = [0, 64], sizes = [8, 32], strides = [1, 1]} : vector<8x96xf32> to vector<8x32xf32>
    %329 = arith.mulf %327, %301 : vector<8x32xf32>
    %330 = arith.mulf %326, %325 : vector<8x32xf32>
    %331 = arith.addf %329, %330 : vector<8x32xf32>
    %332 = math.tanh %331 : vector<8x32xf32>
    %333 = arith.mulf %328, %332 : vector<8x32xf32>
    %c8_i32_120 = arith.constant 8 : i32
    %334 = arith.muli %c1_i32_114, %c8_i32_120 : i32
    %c0_i32_121 = arith.constant 0 : i32
    %335 = arith.addi %c0_i32_121, %334 : i32
    %336 = tpu.assume_multiple %335, 8 : i32
    %337 = arith.truncf %333 : vector<8x32xf32> to vector<8x32xbf16>
    %338 = arith.index_cast %336 : i32 to index
    %c0_122 = arith.constant 0 : index
    %339 = vector.load %arg10[%338, %c0_122] : memref<64x32xbf16, #tpu.memory_space<vmem>>, vector<8x32xbf16>
    tpu.vector_store %arg10[%338, %c0_122], %337 {strides = array<i32>} : memref<64x32xbf16, #tpu.memory_space<vmem>>, vector<8x32xbf16>,
    %c2_i32_123 = arith.constant 2 : i32
    %c8_i32_124 = arith.constant 8 : i32
    %340 = arith.muli %c2_i32_123, %c8_i32_124 : i32
    %341 = tpu.assume_multiple %340, 8 : i32
    %c0_125 = arith.constant 0 : index
    %342 = arith.index_cast %341 : i32 to index
    %c0_126 = arith.constant 0 : index
    %343 = vector.load %arg11[%c0_125, %342, %c0_126] : memref<2x32x128xf32, #tpu.memory_space<vmem>>, vector<1x8x128xf32>
    %344 = vector.shape_cast %343 : vector<1x8x128xf32> to vector<8x128xf32>
    %345 = arith.truncf %333 : vector<8x32xf32> to vector<8x32xbf16>
    %cst_127 = arith.constant dense<0.000000e+00> : vector<8x128xf32>
    %346 = tpu.matmul %345, %262, %cst_127 {dimension_numbers = #tpu.dot_dimension_numbers<[1], [0], [0], [1], [0, 0, 1, 1], [], []>} : vector<8x32xbf16>, vector<32x128xbf16>, vector<8x128xf32> -> vector<8x128xf32>
    %347 = arith.addf %344, %346 : vector<8x128xf32>
    %348 = vector.extract_strided_slice %347 {offsets = [0, 0], sizes = [8, 96], strides = [1, 1]} : vector<8x128xf32> to vector<8x96xf32>
    %349 = arith.negf %348 : vector<8x96xf32>
    %350 = math.exp %349 : vector<8x96xf32>
    %cst_128 = arith.constant 1.000000e+00 : f32
    %351 = vector.broadcast %cst_128 : f32 to vector<8x96xf32>
    %352 = arith.addf %351, %350 : vector<8x96xf32>
    %353 = arith.divf %351, %352 : vector<8x96xf32>
    %354 = vector.extract_strided_slice %347 {offsets = [0, 96], sizes = [8, 32], strides = [1, 1]} : vector<8x128xf32> to vector<8x32xf32>
    %355 = math.tanh %354 : vector<8x32xf32>
    %356 = vector.extract_strided_slice %353 {offsets = [0, 0], sizes = [8, 32], strides = [1, 1]} : vector<8x96xf32> to vector<8x32xf32>
    %357 = vector.extract_strided_slice %353 {offsets = [0, 32], sizes = [8, 32], strides = [1, 1]} : vector<8x96xf32> to vector<8x32xf32>
    %358 = vector.extract_strided_slice %353 {offsets = [0, 64], sizes = [8, 32], strides = [1, 1]} : vector<8x96xf32> to vector<8x32xf32>
    %359 = arith.mulf %357, %331 : vector<8x32xf32>
    %360 = arith.mulf %356, %355 : vector<8x32xf32>
    %361 = arith.addf %359, %360 : vector<8x32xf32>
    %362 = math.tanh %361 : vector<8x32xf32>
    %363 = arith.mulf %358, %362 : vector<8x32xf32>
    %c8_i32_129 = arith.constant 8 : i32
    %364 = arith.muli %c2_i32_123, %c8_i32_129 : i32
    %c0_i32_130 = arith.constant 0 : i32
    %365 = arith.addi %c0_i32_130, %364 : i32
    %366 = tpu.assume_multiple %365, 8 : i32
    %367 = arith.truncf %363 : vector<8x32xf32> to vector<8x32xbf16>
    %368 = arith.index_cast %366 : i32 to index
    %c0_131 = arith.constant 0 : index
    %369 = vector.load %arg10[%368, %c0_131] : memref<64x32xbf16, #tpu.memory_space<vmem>>, vector<8x32xbf16>
    tpu.vector_store %arg10[%368, %c0_131], %367 {strides = array<i32>} : memref<64x32xbf16, #tpu.memory_space<vmem>>, vector<8x32xbf16>,
    %c3_i32_132 = arith.constant 3 : i32
    %c8_i32_133 = arith.constant 8 : i32
    %370 = arith.muli %c3_i32_132, %c8_i32_133 : i32
    %371 = tpu.assume_multiple %370, 8 : i32
    %c0_134 = arith.constant 0 : index
    %372 = arith.index_cast %371 : i32 to index
    %c0_135 = arith.constant 0 : index
    %373 = vector.load %arg11[%c0_134, %372, %c0_135] : memref<2x32x128xf32, #tpu.memory_space<vmem>>, vector<1x8x128xf32>
    %374 = vector.shape_cast %373 : vector<1x8x128xf32> to vector<8x128xf32>
    %375 = arith.truncf %363 : vector<8x32xf32> to vector<8x32xbf16>
    %cst_136 = arith.constant dense<0.000000e+00> : vector<8x128xf32>
    %376 = tpu.matmul %375, %262, %cst_136 {dimension_numbers = #tpu.dot_dimension_numbers<[1], [0], [0], [1], [0, 0, 1, 1], [], []>} : vector<8x32xbf16>, vector<32x128xbf16>, vector<8x128xf32> -> vector<8x128xf32>
    %377 = arith.addf %374, %376 : vector<8x128xf32>
    %378 = vector.extract_strided_slice %377 {offsets = [0, 0], sizes = [8, 96], strides = [1, 1]} : vector<8x128xf32> to vector<8x96xf32>
    %379 = arith.negf %378 : vector<8x96xf32>
    %380 = math.exp %379 : vector<8x96xf32>
    %cst_137 = arith.constant 1.000000e+00 : f32
    %381 = vector.broadcast %cst_137 : f32 to vector<8x96xf32>
    %382 = arith.addf %381, %380 : vector<8x96xf32>
    %383 = arith.divf %381, %382 : vector<8x96xf32>
    %384 = vector.extract_strided_slice %377 {offsets = [0, 96], sizes = [8, 32], strides = [1, 1]} : vector<8x128xf32> to vector<8x32xf32>
    %385 = math.tanh %384 : vector<8x32xf32>
    %386 = vector.extract_strided_slice %383 {offsets = [0, 0], sizes = [8, 32], strides = [1, 1]} : vector<8x96xf32> to vector<8x32xf32>
    %387 = vector.extract_strided_slice %383 {offsets = [0, 32], sizes = [8, 32], strides = [1, 1]} : vector<8x96xf32> to vector<8x32xf32>
    %388 = vector.extract_strided_slice %383 {offsets = [0, 64], sizes = [8, 32], strides = [1, 1]} : vector<8x96xf32> to vector<8x32xf32>
    %389 = arith.mulf %387, %361 : vector<8x32xf32>
    %390 = arith.mulf %386, %385 : vector<8x32xf32>
    %391 = arith.addf %389, %390 : vector<8x32xf32>
    %392 = math.tanh %391 : vector<8x32xf32>
    %393 = arith.mulf %388, %392 : vector<8x32xf32>
    %c8_i32_138 = arith.constant 8 : i32
    %394 = arith.muli %c3_i32_132, %c8_i32_138 : i32
    %c0_i32_139 = arith.constant 0 : i32
    %395 = arith.addi %c0_i32_139, %394 : i32
    %396 = tpu.assume_multiple %395, 8 : i32
    %397 = arith.truncf %393 : vector<8x32xf32> to vector<8x32xbf16>
    %398 = arith.index_cast %396 : i32 to index
    %c0_140 = arith.constant 0 : index
    %399 = vector.load %arg10[%398, %c0_140] : memref<64x32xbf16, #tpu.memory_space<vmem>>, vector<8x32xbf16>
    tpu.vector_store %arg10[%398, %c0_140], %397 {strides = array<i32>} : memref<64x32xbf16, #tpu.memory_space<vmem>>, vector<8x32xbf16>,
    %c4_i32_141 = arith.constant 4 : i32
    %c0_i32_142 = arith.constant 0 : i32
    %c8_i32_143 = arith.constant 8 : i32
    %400 = arith.muli %c0_i32_142, %c8_i32_143 : i32
    %401 = tpu.assume_multiple %400, 8 : i32
    %c1_144 = arith.constant 1 : index
    %402 = arith.index_cast %401 : i32 to index
    %c0_145 = arith.constant 0 : index
    %403 = vector.load %arg11[%c1_144, %402, %c0_145] : memref<2x32x128xf32, #tpu.memory_space<vmem>>, vector<1x8x128xf32>
    %404 = vector.shape_cast %403 : vector<1x8x128xf32> to vector<8x128xf32>
    %405 = arith.truncf %393 : vector<8x32xf32> to vector<8x32xbf16>
    %cst_146 = arith.constant dense<0.000000e+00> : vector<8x128xf32>
    %406 = tpu.matmul %405, %262, %cst_146 {dimension_numbers = #tpu.dot_dimension_numbers<[1], [0], [0], [1], [0, 0, 1, 1], [], []>} : vector<8x32xbf16>, vector<32x128xbf16>, vector<8x128xf32> -> vector<8x128xf32>
    %407 = arith.addf %404, %406 : vector<8x128xf32>
    %408 = vector.extract_strided_slice %407 {offsets = [0, 0], sizes = [8, 96], strides = [1, 1]} : vector<8x128xf32> to vector<8x96xf32>
    %409 = arith.negf %408 : vector<8x96xf32>
    %410 = math.exp %409 : vector<8x96xf32>
    %cst_147 = arith.constant 1.000000e+00 : f32
    %411 = vector.broadcast %cst_147 : f32 to vector<8x96xf32>
    %412 = arith.addf %411, %410 : vector<8x96xf32>
    %413 = arith.divf %411, %412 : vector<8x96xf32>
    %414 = vector.extract_strided_slice %407 {offsets = [0, 96], sizes = [8, 32], strides = [1, 1]} : vector<8x128xf32> to vector<8x32xf32>
    %415 = math.tanh %414 : vector<8x32xf32>
    %416 = vector.extract_strided_slice %413 {offsets = [0, 0], sizes = [8, 32], strides = [1, 1]} : vector<8x96xf32> to vector<8x32xf32>
    %417 = vector.extract_strided_slice %413 {offsets = [0, 32], sizes = [8, 32], strides = [1, 1]} : vector<8x96xf32> to vector<8x32xf32>
    %418 = vector.extract_strided_slice %413 {offsets = [0, 64], sizes = [8, 32], strides = [1, 1]} : vector<8x96xf32> to vector<8x32xf32>
    %419 = arith.mulf %417, %391 : vector<8x32xf32>
    %420 = arith.mulf %416, %415 : vector<8x32xf32>
    %421 = arith.addf %419, %420 : vector<8x32xf32>
    %422 = math.tanh %421 : vector<8x32xf32>
    %423 = arith.mulf %418, %422 : vector<8x32xf32>
    %c8_i32_148 = arith.constant 8 : i32
    %424 = arith.muli %c0_i32_142, %c8_i32_148 : i32
    %c32_i32_149 = arith.constant 32 : i32
    %425 = arith.addi %c32_i32_149, %424 : i32
    %426 = tpu.assume_multiple %425, 8 : i32
    %427 = arith.truncf %423 : vector<8x32xf32> to vector<8x32xbf16>
    %428 = arith.index_cast %426 : i32 to index
    %c0_150 = arith.constant 0 : index
    %429 = vector.load %arg10[%428, %c0_150] : memref<64x32xbf16, #tpu.memory_space<vmem>>, vector<8x32xbf16>
    tpu.vector_store %arg10[%428, %c0_150], %427 {strides = array<i32>} : memref<64x32xbf16, #tpu.memory_space<vmem>>, vector<8x32xbf16>,
    %c1_i32_151 = arith.constant 1 : i32
    %c8_i32_152 = arith.constant 8 : i32
    %430 = arith.muli %c1_i32_151, %c8_i32_152 : i32
    %431 = tpu.assume_multiple %430, 8 : i32
    %c1_153 = arith.constant 1 : index
    %432 = arith.index_cast %431 : i32 to index
    %c0_154 = arith.constant 0 : index
    %433 = vector.load %arg11[%c1_153, %432, %c0_154] : memref<2x32x128xf32, #tpu.memory_space<vmem>>, vector<1x8x128xf32>
    %434 = vector.shape_cast %433 : vector<1x8x128xf32> to vector<8x128xf32>
    %435 = arith.truncf %423 : vector<8x32xf32> to vector<8x32xbf16>
    %cst_155 = arith.constant dense<0.000000e+00> : vector<8x128xf32>
    %436 = tpu.matmul %435, %262, %cst_155 {dimension_numbers = #tpu.dot_dimension_numbers<[1], [0], [0], [1], [0, 0, 1, 1], [], []>} : vector<8x32xbf16>, vector<32x128xbf16>, vector<8x128xf32> -> vector<8x128xf32>
    %437 = arith.addf %434, %436 : vector<8x128xf32>
    %438 = vector.extract_strided_slice %437 {offsets = [0, 0], sizes = [8, 96], strides = [1, 1]} : vector<8x128xf32> to vector<8x96xf32>
    %439 = arith.negf %438 : vector<8x96xf32>
    %440 = math.exp %439 : vector<8x96xf32>
    %cst_156 = arith.constant 1.000000e+00 : f32
    %441 = vector.broadcast %cst_156 : f32 to vector<8x96xf32>
    %442 = arith.addf %441, %440 : vector<8x96xf32>
    %443 = arith.divf %441, %442 : vector<8x96xf32>
    %444 = vector.extract_strided_slice %437 {offsets = [0, 96], sizes = [8, 32], strides = [1, 1]} : vector<8x128xf32> to vector<8x32xf32>
    %445 = math.tanh %444 : vector<8x32xf32>
    %446 = vector.extract_strided_slice %443 {offsets = [0, 0], sizes = [8, 32], strides = [1, 1]} : vector<8x96xf32> to vector<8x32xf32>
    %447 = vector.extract_strided_slice %443 {offsets = [0, 32], sizes = [8, 32], strides = [1, 1]} : vector<8x96xf32> to vector<8x32xf32>
    %448 = vector.extract_strided_slice %443 {offsets = [0, 64], sizes = [8, 32], strides = [1, 1]} : vector<8x96xf32> to vector<8x32xf32>
    %449 = arith.mulf %447, %421 : vector<8x32xf32>
    %450 = arith.mulf %446, %445 : vector<8x32xf32>
    %451 = arith.addf %449, %450 : vector<8x32xf32>
    %452 = math.tanh %451 : vector<8x32xf32>
    %453 = arith.mulf %448, %452 : vector<8x32xf32>
    %c8_i32_157 = arith.constant 8 : i32
    %454 = arith.muli %c1_i32_151, %c8_i32_157 : i32
    %c32_i32_158 = arith.constant 32 : i32
    %455 = arith.addi %c32_i32_158, %454 : i32
    %456 = tpu.assume_multiple %455, 8 : i32
    %457 = arith.truncf %453 : vector<8x32xf32> to vector<8x32xbf16>
    %458 = arith.index_cast %456 : i32 to index
    %c0_159 = arith.constant 0 : index
    %459 = vector.load %arg10[%458, %c0_159] : memref<64x32xbf16, #tpu.memory_space<vmem>>, vector<8x32xbf16>
    tpu.vector_store %arg10[%458, %c0_159], %457 {strides = array<i32>} : memref<64x32xbf16, #tpu.memory_space<vmem>>, vector<8x32xbf16>,
    %c2_i32_160 = arith.constant 2 : i32
    %c8_i32_161 = arith.constant 8 : i32
    %460 = arith.muli %c2_i32_160, %c8_i32_161 : i32
    %461 = tpu.assume_multiple %460, 8 : i32
    %c1_162 = arith.constant 1 : index
    %462 = arith.index_cast %461 : i32 to index
    %c0_163 = arith.constant 0 : index
    %463 = vector.load %arg11[%c1_162, %462, %c0_163] : memref<2x32x128xf32, #tpu.memory_space<vmem>>, vector<1x8x128xf32>
    %464 = vector.shape_cast %463 : vector<1x8x128xf32> to vector<8x128xf32>
    %465 = arith.truncf %453 : vector<8x32xf32> to vector<8x32xbf16>
    %cst_164 = arith.constant dense<0.000000e+00> : vector<8x128xf32>
    %466 = tpu.matmul %465, %262, %cst_164 {dimension_numbers = #tpu.dot_dimension_numbers<[1], [0], [0], [1], [0, 0, 1, 1], [], []>} : vector<8x32xbf16>, vector<32x128xbf16>, vector<8x128xf32> -> vector<8x128xf32>
    %467 = arith.addf %464, %466 : vector<8x128xf32>
    %468 = vector.extract_strided_slice %467 {offsets = [0, 0], sizes = [8, 96], strides = [1, 1]} : vector<8x128xf32> to vector<8x96xf32>
    %469 = arith.negf %468 : vector<8x96xf32>
    %470 = math.exp %469 : vector<8x96xf32>
    %cst_165 = arith.constant 1.000000e+00 : f32
    %471 = vector.broadcast %cst_165 : f32 to vector<8x96xf32>
    %472 = arith.addf %471, %470 : vector<8x96xf32>
    %473 = arith.divf %471, %472 : vector<8x96xf32>
    %474 = vector.extract_strided_slice %467 {offsets = [0, 96], sizes = [8, 32], strides = [1, 1]} : vector<8x128xf32> to vector<8x32xf32>
    %475 = math.tanh %474 : vector<8x32xf32>
    %476 = vector.extract_strided_slice %473 {offsets = [0, 0], sizes = [8, 32], strides = [1, 1]} : vector<8x96xf32> to vector<8x32xf32>
    %477 = vector.extract_strided_slice %473 {offsets = [0, 32], sizes = [8, 32], strides = [1, 1]} : vector<8x96xf32> to vector<8x32xf32>
    %478 = vector.extract_strided_slice %473 {offsets = [0, 64], sizes = [8, 32], strides = [1, 1]} : vector<8x96xf32> to vector<8x32xf32>
    %479 = arith.mulf %477, %451 : vector<8x32xf32>
    %480 = arith.mulf %476, %475 : vector<8x32xf32>
    %481 = arith.addf %479, %480 : vector<8x32xf32>
    %482 = math.tanh %481 : vector<8x32xf32>
    %483 = arith.mulf %478, %482 : vector<8x32xf32>
    %c8_i32_166 = arith.constant 8 : i32
    %484 = arith.muli %c2_i32_160, %c8_i32_166 : i32
    %c32_i32_167 = arith.constant 32 : i32
    %485 = arith.addi %c32_i32_167, %484 : i32
    %486 = tpu.assume_multiple %485, 8 : i32
    %487 = arith.truncf %483 : vector<8x32xf32> to vector<8x32xbf16>
    %488 = arith.index_cast %486 : i32 to index
    %c0_168 = arith.constant 0 : index
    %489 = vector.load %arg10[%488, %c0_168] : memref<64x32xbf16, #tpu.memory_space<vmem>>, vector<8x32xbf16>
    tpu.vector_store %arg10[%488, %c0_168], %487 {strides = array<i32>} : memref<64x32xbf16, #tpu.memory_space<vmem>>, vector<8x32xbf16>,
    %c3_i32_169 = arith.constant 3 : i32
    %c8_i32_170 = arith.constant 8 : i32
    %490 = arith.muli %c3_i32_169, %c8_i32_170 : i32
    %491 = tpu.assume_multiple %490, 8 : i32
    %c1_171 = arith.constant 1 : index
    %492 = arith.index_cast %491 : i32 to index
    %c0_172 = arith.constant 0 : index
    %493 = vector.load %arg11[%c1_171, %492, %c0_172] : memref<2x32x128xf32, #tpu.memory_space<vmem>>, vector<1x8x128xf32>
    %494 = vector.shape_cast %493 : vector<1x8x128xf32> to vector<8x128xf32>
    %495 = arith.truncf %483 : vector<8x32xf32> to vector<8x32xbf16>
    %cst_173 = arith.constant dense<0.000000e+00> : vector<8x128xf32>
    %496 = tpu.matmul %495, %262, %cst_173 {dimension_numbers = #tpu.dot_dimension_numbers<[1], [0], [0], [1], [0, 0, 1, 1], [], []>} : vector<8x32xbf16>, vector<32x128xbf16>, vector<8x128xf32> -> vector<8x128xf32>
    %497 = arith.addf %494, %496 : vector<8x128xf32>
    %498 = vector.extract_strided_slice %497 {offsets = [0, 0], sizes = [8, 96], strides = [1, 1]} : vector<8x128xf32> to vector<8x96xf32>
    %499 = arith.negf %498 : vector<8x96xf32>
    %500 = math.exp %499 : vector<8x96xf32>
    %cst_174 = arith.constant 1.000000e+00 : f32
    %501 = vector.broadcast %cst_174 : f32 to vector<8x96xf32>
    %502 = arith.addf %501, %500 : vector<8x96xf32>
    %503 = arith.divf %501, %502 : vector<8x96xf32>
    %504 = vector.extract_strided_slice %497 {offsets = [0, 96], sizes = [8, 32], strides = [1, 1]} : vector<8x128xf32> to vector<8x32xf32>
    %505 = math.tanh %504 : vector<8x32xf32>
    %506 = vector.extract_strided_slice %503 {offsets = [0, 0], sizes = [8, 32], strides = [1, 1]} : vector<8x96xf32> to vector<8x32xf32>
    %507 = vector.extract_strided_slice %503 {offsets = [0, 32], sizes = [8, 32], strides = [1, 1]} : vector<8x96xf32> to vector<8x32xf32>
    %508 = vector.extract_strided_slice %503 {offsets = [0, 64], sizes = [8, 32], strides = [1, 1]} : vector<8x96xf32> to vector<8x32xf32>
    %509 = arith.mulf %507, %481 : vector<8x32xf32>
    %510 = arith.mulf %506, %505 : vector<8x32xf32>
    %511 = arith.addf %509, %510 : vector<8x32xf32>
    %512 = math.tanh %511 : vector<8x32xf32>
    %513 = arith.mulf %508, %512 : vector<8x32xf32>
    %c8_i32_175 = arith.constant 8 : i32
    %514 = arith.muli %c3_i32_169, %c8_i32_175 : i32
    %c32_i32_176 = arith.constant 32 : i32
    %515 = arith.addi %c32_i32_176, %514 : i32
    %516 = tpu.assume_multiple %515, 8 : i32
    %517 = arith.truncf %513 : vector<8x32xf32> to vector<8x32xbf16>
    %518 = arith.index_cast %516 : i32 to index
    %c0_177 = arith.constant 0 : index
    %519 = vector.load %arg10[%518, %c0_177] : memref<64x32xbf16, #tpu.memory_space<vmem>>, vector<8x32xbf16>
    tpu.vector_store %arg10[%518, %c0_177], %517 {strides = array<i32>} : memref<64x32xbf16, #tpu.memory_space<vmem>>, vector<8x32xbf16>,
    %c4_i32_178 = arith.constant 4 : i32
    %c0_179 = arith.constant 0 : index
    %c0_180 = arith.constant 0 : index
    %520 = vector.load %arg10[%c0_179, %c0_180] : memref<64x32xbf16, #tpu.memory_space<vmem>>, vector<64x32xbf16>
    %521 = arith.extf %520 : vector<64x32xbf16> to vector<64x32xf32>
    %522 = math.tanh %521 : vector<64x32xf32>
    %523 = arith.truncf %522 : vector<64x32xf32> to vector<64x32xbf16>
    %c0_181 = arith.constant 0 : index
    %c0_182 = arith.constant 0 : index
    %524 = vector.load %arg8[%c0_181, %c0_182] : memref<32x8xbf16, #tpu.memory_space<vmem>>, vector<32x8xbf16>
    %cst_183 = arith.constant dense<0.000000e+00> : vector<64x8xf32>
    %525 = tpu.matmul %523, %524, %cst_183 {dimension_numbers = #tpu.dot_dimension_numbers<[1], [0], [0], [1], [0, 0, 1, 1], [], []>} : vector<64x32xbf16>, vector<32x8xbf16>, vector<64x8xf32> -> vector<64x8xf32>
    %c0_184 = arith.constant 0 : index
    %c0_185 = arith.constant 0 : index
    %c0_186 = arith.constant 0 : index
    %526 = vector.load %arg9[%c0_184, %c0_185, %c0_186] : memref<1x64x8xf32, #tpu.memory_space<vmem>>, vector<1x64x8xf32>
    %527 = vector.shape_cast %526 : vector<1x64x8xf32> to vector<64x8xf32>
    %528 = vector.shape_cast %525 : vector<64x8xf32> to vector<1x64x8xf32>
    tpu.vector_store %arg9[%c0_184, %c0_185, %c0_186], %528 {strides = array<i32>} : memref<1x64x8xf32, #tpu.memory_space<vmem>>, vector<1x64x8xf32>,
    return
  }
  func.func @transform_0(%arg0: i32) -> (i32, i32, i32) {
    %c0_i32 = arith.constant 0 : i32
    %c0_i32_0 = arith.constant 0 : i32
    %c0_i32_1 = arith.constant 0 : i32
    return %arg0, %c0_i32, %c0_i32_0 : i32, i32, i32
  }
  func.func @transform_1(%arg0: i32) -> (i32, i32) {
    %c0_i32 = arith.constant 0 : i32
    %c0_i32_0 = arith.constant 0 : i32
    %c0_i32_1 = arith.constant 0 : i32
    return %c0_i32, %c0_i32_0 : i32, i32
  }
  func.func @transform_2(%arg0: i32) -> (i32, i32) {
    %c0_i32 = arith.constant 0 : i32
    %c0_i32_0 = arith.constant 0 : i32
    %c0_i32_1 = arith.constant 0 : i32
    return %c0_i32, %c0_i32_0 : i32, i32
  }
  func.func @transform_3(%arg0: i32) -> (i32, i32) {
    %c0_i32 = arith.constant 0 : i32
    %c0_i32_0 = arith.constant 0 : i32
    %c0_i32_1 = arith.constant 0 : i32
    return %c0_i32, %c0_i32_0 : i32, i32
  }
  func.func @transform_4(%arg0: i32) -> (i32, i32) {
    %c0_i32 = arith.constant 0 : i32
    %c0_i32_0 = arith.constant 0 : i32
    %c0_i32_1 = arith.constant 0 : i32
    return %c0_i32, %c0_i32_0 : i32, i32
  }
  func.func @transform_5(%arg0: i32) -> (i32, i32) {
    %c0_i32 = arith.constant 0 : i32
    %c0_i32_0 = arith.constant 0 : i32
    %c0_i32_1 = arith.constant 0 : i32
    return %c0_i32, %c0_i32_0 : i32, i32
  }
  func.func @transform_6(%arg0: i32) -> (i32, i32) {
    %c0_i32 = arith.constant 0 : i32
    %c0_i32_0 = arith.constant 0 : i32
    %c0_i32_1 = arith.constant 0 : i32
    return %c0_i32, %c0_i32_0 : i32, i32
  }
  func.func @transform_7(%arg0: i32) -> (i32, i32) {
    %c0_i32 = arith.constant 0 : i32
    %c0_i32_0 = arith.constant 0 : i32
    %c0_i32_1 = arith.constant 0 : i32
    return %c0_i32, %c0_i32_0 : i32, i32
  }
  func.func @transform_8(%arg0: i32) -> (i32, i32, i32) {
    %c0_i32 = arith.constant 0 : i32
    %c0_i32_0 = arith.constant 0 : i32
    %c0_i32_1 = arith.constant 0 : i32
    return %arg0, %c0_i32, %c0_i32_0 : i32, i32, i32
  }
}

</mosaic_0001>

<bundles_post_ra>
// kernel: custom-call
= control target key start
LH: loop header
LB: loop body
LE: loop exit
PB: predicated region body
PF: predicated region fallthrough
CT: control target
= control target key end

     0   :  { %s92_s0 = inlined_call_operand.vmem [shape: f32[2,8,2,2], index: 0, kind: input, shape index: {}]   ;;  %s93_s1 = inlined_call_operand.vmem [shape: f32[2,8,2,2], index: 1, kind: input, shape index: {}]   ;;  %s94_s2 = inlined_call_operand.hbm [shape: c64[2,8,2,2], index: 2, kind: output, shape index: {}]  }
   0x1   :  { %s3_s11 = scalar_lea.hbm %s94_s2, 128 }
   0x2   :  { %4 = vsyncpa [#allocation0], 0  ;;  %s5_s14 = sshll.u32 %s92_s0, 4  ;;  %s6_s14 = int_to_ptr.vmem [resolvable:$true] %s5_s14 }
   0x3   :  { %s18_s15 = scalar_lea.vmem %s6_s14, 128  ;;  %p23_p1 = scmp.lt.s32.totalorder %s6_s14, %s6_s14 }
   0x4   :  { %p19_p0 = scmp.ne.s32.totalorder %s6_s14, %s18_s15  ;;  %p24_p2 = scmp.lt.s32.totalorder %s18_s15, %s18_s15 }
   0x6   :  { %p25_p3 = por %p24_p2, %p23_p1 }
   0x8   :  { %p26_p4 = pnand %p25_p3, %p19_p0 }
   0xa   :  { %29 = shalt.err (!%p26_p4)  }
   0xb   :  { %8 = dma.vmem_to_hbm [thread:$0]  %s6_s14, 128, %s94_s2, [#allocation0] }
   0xc   :  { %61 = dma.done.wait [#allocation0], 128  }
   0xd   :  { %62 = vsyncadd [#allocation0], 4294967168 }
   0xe   :  { %10 = vsyncpa [#allocation0], 1 }
   0xf   :  { %11 = vsyncpa [#allocation1], 0  ;;  %s12_s0 = sshll.u32 %s93_s1, 4  ;;  %s13_s0 = int_to_ptr.vmem [resolvable:$true] %s12_s0 }
  0x10   :  { %s38_s20 = scalar_lea.vmem %s13_s0, 128  ;;  %p43_p6 = scmp.lt.s32.totalorder %s13_s0, %s13_s0 }
  0x11   :  { %p39_p5 = scmp.ne.s32.totalorder %s13_s0, %s38_s20  ;;  %p44_p7 = scmp.lt.s32.totalorder %s38_s20, %s38_s20 }
  0x13   :  { %p45_p8 = por %p44_p7, %p43_p6 }
  0x15   :  { %p46_p9 = pnand %p45_p8, %p39_p5 }
  0x17   :  { %49 = shalt.err (!%p46_p9)  }
  0x18   :  { %15 = dma.vmem_to_hbm [thread:$0]  %s13_s0, 128, %s3_s11, [#allocation1] }
  0x19   :  { %63 = dma.done.wait [#allocation1], 128  }
  0x1a   :  { %64 = vsyncadd [#allocation1], 4294967168 }
  0x1b   :  { %17 = vsyncpa [#allocation1], 1 }

// kernel: lstm_regressor_with_h_forward.1
= control target key start
LH: loop header
LB: loop body
LE: loop exit
PB: predicated region body
PF: predicated region fallthrough
CT: control target
= control target key end

     0   :  { %vm63_vm0 = vcmask 1043456   ;;  %vm56_vm1 = vcmask 64512   ;;  %v2319_v5 = vmov 0.0   ;;  %vm2320_vm2 = vmmov 0   ;;  %s2323_s18 = smov 64   ;;  %s2781_s1 = inlined_call_operand.vmem [shape: bf16[8,128], index: 1, kind: input, shape index: {}]   ;;  %s2782_s0 = inlined_call_operand.vmem [shape: bf16[1,64,8], index: 0, kind: input, shape index: {}]   ;;  %s2783_s2 = inlined_call_operand.vmem [shape: bf16[32,128], index: 2, kind: input, shape index: {}]   ;;  %s2784_s3 = inlined_call_operand.vmem [shape: f32[1,128], index: 3, kind: input, shape index: {}]   ;;  %s2785_s4 = inlined_call_operand.vmem [shape: bf16[32,128], index: 4, kind: input, shape index: {}]   ;;  %s2786_s5 = inlined_call_operand.vmem [shape: bf16[32,128], index: 5, kind: input, shape index: {}]   ;;  %s2787_s6 = inlined_call_operand.vmem [shape: f32[1,128], index: 6, kind: input, shape index: {}]   ;;  %s2788_s7 = inlined_call_operand.vmem [shape: bf16[32,8], index: 7, kind: input, shape index: {}]   ;;  %s2789_s8 = inlined_call_operand.vmem [shape: f32[1,64,8], index: 8, kind: output, shape index: {}]  }
   0x1   :  { %v30_v0 = vld [vmem:[%s2781_s1] sm:$0xf]  ;;  %v2160_v3 = vld [vmem:[%s2782_s0 + $0x10] sm:$0xff]   ;;  %v2161_v4 = vld [vmem:[%s2782_s0 + $0x8] sm:$0xff]   ;;  %v2321_v9 = vmov 0   ;;  %vm207_vm3 = vcmask 261120  }
   0x2   :  { %2152 = vmatprep.subr.msk.bf16.mxu0 %vm63_vm0, %v30_v0  ;;  %2153 = vmatprep.subr.msk.bf16.mxu1 %vm63_vm0, %v30_v0  ;;  %v65_v1 = vsel %vm63_vm0, %v30_v0, 0  ;;  %v2159_v2 = vld [vmem:[%s2782_s0] sm:$0xff]   ;;  %v2162_v6 = vld [vmem:[%s2782_s0 + $0x18] sm:$0xff]   ;;  %v2392_v7 = vld [vmem:[%s2783_s2 + $0x8] sm:$0xff]   ;;  %vm283_vm4 = vcmask 257024  }
   0x3   :  { %1985 = vmatpush3.bf16.msra.mxu0 %v65_v1  ;;  %1991 = vmatpush3.bf16.msra.mxu1 %v65_v1  ;;  %v2401_v8 = vld [vmem:[%s2783_s2] sm:$0xff]  }
   0x4   :  { %1986 = vmatprep.mubr.msk.bf16.mxu0 %vm56_vm1, %v2159_v2  ;;  %1996 = vmatprep.subr.bf16.mxu1 %v2319_v5  ;;  %v1805_v10 = vld [vmem:[%s2784_s3] ss:$0 sm:$0xff]  ;;  %s2322_s3 = smov 32  }
   0x5   :  { %1992 = vmatprep.mubr.msk.bf16.mxu1 %vm56_vm1, %v2160_v3  ;;  %2012 = vmatprep.subr.bf16.mxu0 %v2319_v5 }
   0x6   :  { %1987 = vmatmul.mubr.msk.bf16.vlgmr.msra.gmra.mxu0 %vm56_vm1, %v2161_v4  ;;  %1993 = vmatmul.mubr.msk.bf16.vlgmr.msra.gmra.mxu1 %vm56_vm1, %v2162_v6 }
   0x7   :  { %2016 = vmatprep.mubr.msk.bf16.mxu0 %vm2320_vm2, %v2319_v5  ;;  %1997 = vmatpush3.bf16.msra.mxu1 %v2392_v7 }
   0x8   :  { %2000 = vmatprep.mubr.msk.bf16.mxu1 %vm2320_vm2, %v2319_v5  ;;  %1998 = vmatprep.subr.bf16.mxu1 %v2319_v5 }
   0x9   :  { %2013 = vmatpush3.bf16.msra.mxu0 %v2392_v7 }
   0xa   :  { %2014 = vmatprep.subr.bf16.mxu0 %v2319_v5 }
   0xb   :  { %1999 = vmatpush3.bf16.msra.mxu1 %v2401_v8 }
   0xc   :  { %2004 = vmatprep.subr.bf16.mxu1 %v2319_v5 }
   0xd   :  { %2015 = vmatpush3.bf16.msra.mxu0 %v2401_v8 }
   0xe   :  { %2028 = vmatprep.subr.bf16.mxu0 %v2319_v5  ;;  %2001 = vmatmul.mubr.bf16.vlgmr.msra.gmra.mxu1 %v2321_v9 }
   0xf   :  { %2005 = vmatpush3.bf16.msra.mxu1 %v2392_v7  ;;  %2008 = vmatprep.mubr.msk.bf16.mxu1 %vm2320_vm2, %v2319_v5 }
  0x10   :  { %2006 = vmatprep.subr.bf16.mxu1 %v2319_v5 }
  0x13   :  { %2007 = vmatpush3.bf16.msra.mxu1 %v2401_v8 }
  0x14   :  { %2020 = vmatprep.subr.bf16.mxu1 %v2319_v5 }
  0xc6   :  { %v1988_v11 = vpop.f32.mrf.mxu0  ;;  %v1994_v13 = vpop.f32.mrf.mxu1 }
  0xc7   :  { %v2422_v12 = vadd.f32 %v1988_v11, %v1805_v10  ;;  %v2424_v14 = vadd.f32 %v1994_v13, %v1805_v10 }
  0xc8   :  { %v101_v15 = vpop.f32.mrf.mxu0  ;;  %v174_v16 = vpop.f32.mrf.mxu1 }
  0xc9   :  { %v2426_v17 = vadd.f32 %v1805_v10, %v174_v16  ;;  %v102_v23 = vadd.f32 %v1805_v10, %v101_v15 }
  0xca   :  { %v1989_v18 = vpop.f32.mrf.mxu0  ;;  %v1995_v20 = vpop.f32.mrf.mxu1 }
  0xcb   :  { %v2428_v19 = vadd.f32 %v1989_v18, %v1805_v10  ;;  %v2430_v21 = vadd.f32 %v1995_v20, %v1805_v10 }
  0xcc   :  { %v177_v22 = vpop.f32.mrf.mxu1  ;;  %v104_v45 = vpop.f32.mrf.mxu0 }
  0xcd   :  { %v2432_v24 = vadd.f32 %v1805_v10, %v177_v22  ;;  %v105_v46 = vadd.f32 %v1805_v10, %v104_v45 }
  0xce   :  { %v245_v25 = vpop.f32.mrf.mxu1 }
  0xcf   :  { %v251_v26 = vadd.f32 %v245_v25, %v102_v23 }
  0xd0   :  { %v2002_v27 = vpop.f32.mrf.mxu1 }
  0xd1   :  { %2175 = vtanh.f32 %v251_v26  ;;  %v1816_v31 = vmul.f32 -1.442695, %v251_v26 }
  0xd2   :  { %v248_v28 = vpop.f32.mrf.mxu1 }
  0xd3   :  { %2177 = vpow2.f32 %v1816_v31 }
  0xd4   :  { %v2003_v29 = vpop.f32.mrf.mxu1 }
  0xde   :  { %v2176_v30 = vpop.eup %2175 }
  0xdf   :  { %261 = vrot.lane.b32.xlu0 %v2176_v30, %s2322_s3 }
  0xe0   :  { %v2178_v32 = vpop.eup %2177 }
  0xe1   :  { %v255_v33 = vadd.f32 1.0, %v2178_v32 }
  0xe3   :  { %2179 = vrcp.f32 %v255_v33 }
  0xf0   :  { %v2180_v34 = vpop.eup %2179 }
  0xf1   :  { %v259_v37 = vmul.f32 0.0, %v2180_v34 }
 0x151   :  { %v262_v35 = vpop.permute.xlu0 %261 }
 0x152   :  { %v264_v36 = vmul.f32 %v2180_v34, %v262_v35 }
 0x154   :  { %266 = vrot.lane.b32.xlu0 %v264_v36, %s2322_s3 }
 0x1c6   :  { %v267_v38 = vpop.permute.xlu0 %266 }
 0x1c7   :  { %v269_v39 = vadd.f32 %v267_v38, %v259_v37 }
 0x1c9   :  { %2181 = vtanh.f32 %v269_v39 }
 0x1d6   :  { %v2182_v40 = vpop.eup %2181 }
 0x1d7   :  { %272 = vrot.lane.b32.xlu1 %v2182_v40, %s2322_s3 }
 0x249   :  { %v273_v41 = vpop.permute.xlu1 %272 }
 0x24a   :  { %v275_v42 = vmul.f32 %v2180_v34, %v273_v41 }
 0x24c   :  { %v2437_v43 = vpack.c.bf16 %v275_v42, %v275_v42 }
 0x24e   :  { %287 = vrot.lane.b32.xlu1 %v2437_v43, %s2323_s18 }
 0x2c0   :  { %v288_v44 = vpop.permute.xlu1 %287 }
 0x2c1   :  { %2009 = vmatmul.mubr.msk.bf16.vlgmr.msra.gmra.mxu1 %vm207_vm3, %v288_v44 }
 0x2c2   :  { %2021 = vmatpush3.bf16.msra.mxu1 %v2392_v7  ;;  %2024 = vmatprep.mubr.msk.bf16.mxu1 %vm2320_vm2, %v2319_v5 }
 0x2c3   :  { %2022 = vmatprep.subr.bf16.mxu1 %v2319_v5 }
 0x2c6   :  { %2023 = vmatpush3.bf16.msra.mxu1 %v2401_v8 }
 0x2c7   :  { %2036 = vmatprep.subr.bf16.mxu1 %v2319_v5 }
 0x381   :  { %v326_v47 = vpop.f32.mrf.mxu1 }
 0x382   :  { %v332_v48 = vadd.f32 %v326_v47, %v105_v46 }
 0x383   :  { %v2010_v49 = vpop.f32.mrf.mxu1 }
 0x384   :  { %2183 = vtanh.f32 %v332_v48  ;;  %v1819_v53 = vmul.f32 -1.442695, %v332_v48 }
 0x385   :  { %v329_v50 = vpop.f32.mrf.mxu1 }
 0x386   :  { %2185 = vpow2.f32 %v1819_v53 }
 0x387   :  { %v2011_v51 = vpop.f32.mrf.mxu1 }
 0x391   :  { %v2184_v52 = vpop.eup %2183 }
 0x392   :  { %342 = vrot.lane.b32.xlu0 %v2184_v52, %s2322_s3 }
 0x393   :  { %v2186_v54 = vpop.eup %2185 }
 0x394   :  { %v336_v55 = vadd.f32 1.0, %v2186_v54 }
 0x396   :  { %2187 = vrcp.f32 %v336_v55 }
 0x3a3   :  { %v2188_v56 = vpop.eup %2187 }
 0x3a4   :  { %v340_v59 = vmul.f32 %v2188_v56, %v269_v39 }
 0x404   :  { %v343_v57 = vpop.permute.xlu0 %342 }
 0x405   :  { %v345_v58 = vmul.f32 %v2188_v56, %v343_v57 }
 0x407   :  { %347 = vrot.lane.b32.xlu1 %v345_v58, %s2322_s3 }
 0x479   :  { %v348_v60 = vpop.permute.xlu1 %347 }
 0x47a   :  { %v350_v61 = vadd.f32 %v348_v60, %v340_v59 }
 0x47c   :  { %2189 = vtanh.f32 %v350_v61 }
 0x489   :  { %v2190_v62 = vpop.eup %2189 }
 0x48a   :  { %353 = vrot.lane.b32.xlu0 %v2190_v62, %s2322_s3 }
 0x4fc   :  { %v354_v63 = vpop.permute.xlu0 %353 }
 0x4fd   :  { %v356_v0 = vmul.f32 %v2188_v56, %v354_v63 }
 0x4ff   :  { %v2451_v1 = vpack.c.bf16 %v356_v0, %v356_v0 }
 0x501   :  { %368 = vrot.lane.b32.xlu1 %v2451_v1, %s2323_s18 }
 0x573   :  { %v369_v2 = vpop.permute.xlu1 %368 }
 0x574   :  { %2017 = vmatmul.mubr.msk.bf16.vlgmr.msra.gmra.mxu0 %vm207_vm3, %v369_v2 }
 0x575   :  { %2029 = vmatpush3.bf16.msra.mxu0 %v2392_v7  ;;  %2032 = vmatprep.mubr.msk.bf16.mxu0 %vm2320_vm2, %v2319_v5 }
 0x576   :  { %2030 = vmatprep.subr.bf16.mxu0 %v2319_v5 }
 0x579   :  { %2031 = vmatpush3.bf16.msra.mxu0 %v2401_v8 }
 0x57a   :  { %2044 = vmatprep.subr.bf16.mxu0 %v2319_v5 }
 0x634   :  { %v407_v3 = vpop.f32.mrf.mxu0 }
 0x635   :  { %v413_v4 = vadd.f32 %v407_v3, %v2422_v12 }
 0x636   :  { %v2018_v6 = vpop.f32.mrf.mxu0 }
 0x637   :  { %2191 = vtanh.f32 %v413_v4  ;;  %v1822_v15 = vmul.f32 -1.442695, %v413_v4 }
 0x638   :  { %v410_v10 = vpop.f32.mrf.mxu0 }
 0x639   :  { %2193 = vpow2.f32 %v1822_v15 }
 0x63a   :  { %v2019_v11 = vpop.f32.mrf.mxu0 }
 0x644   :  { %v2192_v13 = vpop.eup %2191 }
 0x645   :  { %423 = vrot.lane.b32.xlu0 %v2192_v13, %s2322_s3 }
 0x646   :  { %v2194_v16 = vpop.eup %2193 }
 0x647   :  { %v417_v18 = vadd.f32 1.0, %v2194_v16 }
 0x649   :  { %2195 = vrcp.f32 %v417_v18 }
 0x656   :  { %v2196_v20 = vpop.eup %2195 }
 0x657   :  { %v421_v25 = vmul.f32 %v2196_v20, %v350_v61 }
 0x6b7   :  { %v424_v22 = vpop.permute.xlu0 %423 }
 0x6b8   :  { %v426_v23 = vmul.f32 %v2196_v20, %v424_v22 }
 0x6ba   :  { %428 = vrot.lane.b32.xlu1 %v426_v23, %s2322_s3 }
 0x72c   :  { %v429_v26 = vpop.permute.xlu1 %428 }
 0x72d   :  { %v431_v12 = vadd.f32 %v429_v26, %v421_v25 }
 0x72f   :  { %2197 = vtanh.f32 %v431_v12 }
 0x73c   :  { %v2198_v27 = vpop.eup %2197 }
 0x73d   :  { %434 = vrot.lane.b32.xlu0 %v2198_v27, %s2322_s3 }
 0x7af   :  { %v435_v28 = vpop.permute.xlu0 %434 }
 0x7b0   :  { %v437_v29 = vmul.f32 %v2196_v20, %v435_v28 }
 0x7b2   :  { %v2466_v30 = vpack.c.bf16 %v437_v29, %v437_v29 }
 0x7b4   :  { %449 = vrot.lane.b32.xlu1 %v2466_v30, %s2323_s18 }
 0x826   :  { %v450_v31 = vpop.permute.xlu1 %449 }
 0x827   :  { %2025 = vmatmul.mubr.msk.bf16.vlgmr.msra.gmra.mxu1 %vm207_vm3, %v450_v31 }
 0x828   :  { %2037 = vmatpush3.bf16.msra.mxu1 %v2392_v7  ;;  %2040 = vmatprep.mubr.msk.bf16.mxu1 %vm2320_vm2, %v2319_v5 }
 0x829   :  { %2038 = vmatprep.subr.bf16.mxu1 %v2319_v5 }
 0x82c   :  { %2039 = vmatpush3.bf16.msra.mxu1 %v2401_v8 }
 0x82d   :  { %2052 = vmatprep.subr.bf16.mxu1 %v2319_v5 }
 0x8e7   :  { %v488_v32 = vpop.f32.mrf.mxu1 }
 0x8e8   :  { %v494_v33 = vadd.f32 %v488_v32, %v2428_v19 }
 0x8e9   :  { %v2026_v34 = vpop.f32.mrf.mxu1 }
 0x8ea   :  { %2199 = vtanh.f32 %v494_v33  ;;  %v1825_v38 = vmul.f32 -1.442695, %v494_v33 }
 0x8eb   :  { %v491_v35 = vpop.f32.mrf.mxu1 }
 0x8ec   :  { %2201 = vpow2.f32 %v1825_v38 }
 0x8ed   :  { %v2027_v36 = vpop.f32.mrf.mxu1 }
 0x8f7   :  { %v2200_v37 = vpop.eup %2199 }
 0x8f8   :  { %504 = vrot.lane.b32.xlu0 %v2200_v37, %s2322_s3 }
 0x8f9   :  { %v2202_v39 = vpop.eup %2201 }
 0x8fa   :  { %v498_v40 = vadd.f32 1.0, %v2202_v39 }
 0x8fc   :  { %2203 = vrcp.f32 %v498_v40 }
 0x909   :  { %v2204_v41 = vpop.eup %2203 }
 0x90a   :  { %v502_v45 = vmul.f32 %v2204_v41, %v431_v12 }
 0x96a   :  { %v505_v42 = vpop.permute.xlu0 %504 }
 0x96b   :  { %v507_v44 = vmul.f32 %v2204_v41, %v505_v42 }
 0x96d   :  { %509 = vrot.lane.b32.xlu1 %v507_v44, %s2322_s3 }
 0x9df   :  { %v510_v46 = vpop.permute.xlu1 %509 }
 0x9e0   :  { %v512_v19 = vadd.f32 %v510_v46, %v502_v45 }
 0x9e2   :  { %2205 = vtanh.f32 %v512_v19 }
 0x9ef   :  { %v2206_v47 = vpop.eup %2205 }
 0x9f0   :  { %515 = vrot.lane.b32.xlu0 %v2206_v47, %s2322_s3 }
 0xa62   :  { %v516_v48 = vpop.permute.xlu0 %515 }
 0xa63   :  { %v518_v49 = vmul.f32 %v2204_v41, %v516_v48 }
 0xa65   :  { %v2481_v50 = vpack.c.bf16 %v518_v49, %v518_v49 }
 0xa67   :  { %531 = vrot.lane.b32.xlu1 %v2481_v50, %s2323_s18 }
 0xad9   :  { %v532_v51 = vpop.permute.xlu1 %531 }
 0xada   :  { %2033 = vmatmul.mubr.msk.bf16.vlgmr.msra.gmra.mxu0 %vm207_vm3, %v532_v51 }
 0xadb   :  { %2045 = vmatpush3.bf16.msra.mxu0 %v2392_v7  ;;  %2048 = vmatprep.mubr.msk.bf16.mxu0 %vm2320_vm2, %v2319_v5 }
 0xadc   :  { %2046 = vmatprep.subr.bf16.mxu0 %v2319_v5 }
 0xadf   :  { %2047 = vmatpush3.bf16.msra.mxu0 %v2401_v8 }
 0xb9a   :  { %v570_v52 = vpop.f32.mrf.mxu0 }
 0xb9b   :  { %v576_v53 = vadd.f32 %v570_v52, %v2426_v17 }
 0xb9c   :  { %v2034_v54 = vpop.f32.mrf.mxu0 }
 0xb9d   :  { %2207 = vtanh.f32 %v576_v53  ;;  %v1828_v58 = vmul.f32 -1.442695, %v576_v53 }
 0xb9e   :  { %v573_v55 = vpop.f32.mrf.mxu0 }
 0xb9f   :  { %2209 = vpow2.f32 %v1828_v58 }
 0xba0   :  { %v2035_v56 = vpop.f32.mrf.mxu0 }
 0xbaa   :  { %v2208_v57 = vpop.eup %2207 }
 0xbab   :  { %586 = vrot.lane.b32.xlu0 %v2208_v57, %s2322_s3 }
 0xbac   :  { %v2210_v59 = vpop.eup %2209 }
 0xbad   :  { %v580_v60 = vadd.f32 1.0, %v2210_v59  ;;  %v2555_v59 = vld [vmem:[%s2786_s5] sm:$0xff]  }
 0xbaf   :  { %2211 = vrcp.f32 %v580_v60 }
 0xbbc   :  { %v2212_v61 = vpop.eup %2211 }
 0xbbd   :  { %v584_v0 = vmul.f32 %v2212_v61, %v512_v19 }
 0xc1d   :  { %v587_v62 = vpop.permute.xlu0 %586 }
 0xc1e   :  { %v589_v63 = vmul.f32 %v2212_v61, %v587_v62 }
 0xc20   :  { %591 = vrot.lane.b32.xlu1 %v589_v63, %s2322_s3  ;;  %v2578_v63 = vld [vmem:[%s2787_s6] ss:$0 sm:$0xff] }
 0xc92   :  { %v592_v2 = vpop.permute.xlu1 %591 }
 0xc93   :  { %v594_v17 = vadd.f32 %v592_v2, %v584_v0 }
 0xc95   :  { %2213 = vtanh.f32 %v594_v17 }
 0xca2   :  { %v2214_v3 = vpop.eup %2213 }
 0xca3   :  { %597 = vrot.lane.b32.xlu0 %v2214_v3, %s2322_s3 }
 0xd15   :  { %v598_v4 = vpop.permute.xlu0 %597 }
 0xd16   :  { %v600_v6 = vmul.f32 %v2212_v61, %v598_v4 }
 0xd18   :  { %v2495_v10 = vpack.c.bf16 %v600_v6, %v600_v6 }
 0xd1a   :  { %613 = vrot.lane.b32.xlu1 %v2495_v10, %s2323_s18 }
 0xd8c   :  { %v614_v11 = vpop.permute.xlu1 %613 }
 0xd8d   :  { %2041 = vmatmul.mubr.msk.bf16.vlgmr.msra.gmra.mxu1 %vm207_vm3, %v614_v11 }
 0xd8e   :  { %2053 = vmatpush3.bf16.msra.mxu1 %v2392_v7  ;;  %2056 = vmatprep.mubr.msk.bf16.mxu1 %vm2320_vm2, %v2319_v5 }
 0xd8f   :  { %2054 = vmatprep.subr.bf16.mxu1 %v2319_v5 }
 0xd92   :  { %2055 = vmatpush3.bf16.msra.mxu1 %v2401_v8 }
 0xe4d   :  { %v652_v13 = vpop.f32.mrf.mxu1 }
 0xe4e   :  { %v658_v15 = vadd.f32 %v652_v13, %v2432_v24 }
 0xe4f   :  { %v2042_v16 = vpop.f32.mrf.mxu1 }
 0xe50   :  { %2215 = vtanh.f32 %v658_v15  ;;  %v1831_v23 = vmul.f32 -1.442695, %v658_v15 }
 0xe51   :  { %v655_v18 = vpop.f32.mrf.mxu1 }
 0xe52   :  { %2217 = vpow2.f32 %v1831_v23 }
 0xe53   :  { %v2043_v20 = vpop.f32.mrf.mxu1 }
 0xe5d   :  { %v2216_v22 = vpop.eup %2215 }
 0xe5e   :  { %668 = vrot.lane.b32.xlu0 %v2216_v22, %s2322_s3 }
 0xe5f   :  { %v2218_v7 = vpop.eup %2217 }
 0xe60   :  { %v662_v25 = vadd.f32 1.0, %v2218_v7 }
 0xe62   :  { %2219 = vrcp.f32 %v662_v25 }
 0xe6f   :  { %v2220_v26 = vpop.eup %2219 }
 0xe70   :  { %v666_v8 = vmul.f32 %v2220_v26, %v594_v17 }
 0xed0   :  { %v669_v12 = vpop.permute.xlu0 %668 }
 0xed1   :  { %v671_v27 = vmul.f32 %v2220_v26, %v669_v12 }
 0xed3   :  { %673 = vrot.lane.b32.xlu1 %v671_v27, %s2322_s3 }
 0xf45   :  { %v674_v28 = vpop.permute.xlu1 %673 }
 0xf46   :  { %v676_v24 = vadd.f32 %v674_v28, %v666_v8 }
 0xf48   :  { %2221 = vtanh.f32 %v676_v24 }
 0xf55   :  { %v2222_v29 = vpop.eup %2221 }
 0xf56   :  { %679 = vrot.lane.b32.xlu0 %v2222_v29, %s2322_s3 }
 0xfc8   :  { %v680_v31 = vpop.permute.xlu0 %679 }
 0xfc9   :  { %v682_v32 = vmul.f32 %v2220_v26, %v680_v31 }
 0xfcb   :  { %v2509_v33 = vpack.c.bf16 %v682_v32, %v682_v32 }
 0xfcd   :  { %695 = vrot.lane.b32.xlu1 %v2509_v33, %s2323_s18 }
0x103f   :  { %v696_v34 = vpop.permute.xlu1 %695 }
0x1040   :  { %2049 = vmatmul.mubr.msk.bf16.vlgmr.msra.gmra.mxu0 %vm207_vm3, %v696_v34 }
0x1100   :  { %v734_v35 = vpop.f32.mrf.mxu0 }
0x1101   :  { %v740_v36 = vadd.f32 %v734_v35, %v2424_v14 }
0x1102   :  { %v2050_v37 = vpop.f32.mrf.mxu0 }
0x1103   :  { %2223 = vtanh.f32 %v740_v36  ;;  %v1834_v41 = vmul.f32 -1.442695, %v740_v36 }
0x1104   :  { %v737_v38 = vpop.f32.mrf.mxu0 }
0x1105   :  { %2225 = vpow2.f32 %v1834_v41 }
0x1106   :  { %v2051_v39 = vpop.f32.mrf.mxu0 }
0x1110   :  { %v2224_v40 = vpop.eup %2223 }
0x1111   :  { %750 = vrot.lane.b32.xlu0 %v2224_v40, %s2322_s3 }
0x1112   :  { %v2226_v42 = vpop.eup %2225 }
0x1113   :  { %v744_v44 = vadd.f32 1.0, %v2226_v42 }
0x1115   :  { %2227 = vrcp.f32 %v744_v44 }
0x1122   :  { %v2228_v45 = vpop.eup %2227 }
0x1123   :  { %v748_v14 = vmul.f32 %v2228_v45, %v676_v24 }
0x1183   :  { %v751_v46 = vpop.permute.xlu0 %750 }
0x1184   :  { %v753_v19 = vmul.f32 %v2228_v45, %v751_v46 }
0x1186   :  { %755 = vrot.lane.b32.xlu1 %v753_v19, %s2322_s3 }
0x118a   :  { %280 = vrot.lane.b32.xlu1 %v2437_v43, %s2323_s18  ;;  %v2165_v43 = vld [vmem:[%s2785_s4 + $0x8] sm:$0xff]  }
0x118b   :  { %2060 = vmatprep.subr.bf16.mxu0 %v2165_v43  ;;  %2068 = vmatprep.subr.bf16.mxu1 %v2165_v43 }
0x118c   :  { %2061 = vmatpush3.bf16.msra.mxu0 %v2165_v43 }
0x118e   :  { %442 = vrot.lane.b32.xlu1 %v2466_v30, %s2323_s18  ;;  %v2166_v30 = vld [vmem:[%s2785_s4] sm:$0xff]  }
0x118f   :  { %2062 = vmatprep.subr.bf16.mxu0 %v2166_v30 }
0x1190   :  { %2063 = vmatpush3.bf16.msra.mxu0 %v2166_v30 }
0x1191   :  { %2076 = vmatprep.subr.bf16.mxu0 %v2319_v5 }
0x11f8   :  { %v756_v47 = vpop.permute.xlu1 %755 }
0x11f9   :  { %v2521_v48 = vadd.f32 %v756_v47, %v748_v14 }
0x11fb   :  { %2229 = vtanh.f32 %v2521_v48 }
0x11fc   :  { %v281_v49 = vpop.permute.xlu1 %280 }
0x11fd   :  { %284 = vst.msk [vmem:[#allocation2] sm:$0xf] %vm283_vm4, %v281_v49 }
0x1200   :  { %v443_v51 = vpop.permute.xlu1 %442 }
0x1201   :  { %446 = vst.msk [vmem:[#allocation2 + $0x8] sm:$0xf] %vm283_vm4, %v443_v51 }
0x1208   :  { %v2230_v52 = vpop.eup %2229 }
0x1209   :  { %761 = vrot.lane.b32.xlu0 %v2230_v52, %s2322_s3 }
0x120d   :  { %361 = vrot.lane.b32.xlu0 %v2451_v1, %s2323_s18  ;;  %v2548_v1 = vld [vmem:[%s2786_s5 + $0x8] sm:$0xff]  }
0x1211   :  { %523 = vrot.lane.b32.xlu0 %v2481_v50, %s2323_s18 }
0x127b   :  { %v762_v53 = vpop.permute.xlu0 %761 }
0x127c   :  { %v764_v54 = vmul.f32 %v2228_v45, %v762_v53 }
0x127e   :  { %v2538_v55 = vpack.c.bf16 %v764_v54, %v764_v54 }
0x127f   :  { %v362_v56 = vpop.permute.xlu0 %361 }
0x1280   :  { %365 = vst.msk [vmem:[#allocation2 + $0x4] sm:$0xf] %vm283_vm4, %v362_v56  ;;  %777 = vrot.lane.b32.xlu1 %v2538_v55, %s2323_s18 }
0x1283   :  { %v524_v57 = vpop.permute.xlu0 %523 }
0x1284   :  { %527 = vst.msk [vmem:[#allocation2 + $0xc] sm:$0xf] %vm283_vm4, %v524_v57 }
0x1287   :  { %v2167_v58 = vld [vmem:[#allocation2] sm:$0xff]  }
0x1288   :  { %2064 = vmatprep.mubr.msk.bf16.mxu0 %vm207_vm3, %v2167_v58 }
0x128b   :  { %v2168_v50 = vld [vmem:[#allocation2 + $0x8] sm:$0xff]  }
0x128c   :  { %2065 = vmatmul.mubr.msk.bf16.vlgmr.msra.gmra.mxu0 %vm207_vm3, %v2168_v50 }
0x128d   :  { %2077 = vmatpush3.bf16.msra.mxu0 %v2548_v1  ;;  %2080 = vmatprep.mubr.msk.bf16.mxu0 %vm2320_vm2, %v2319_v5 }
0x128e   :  { %2078 = vmatprep.subr.bf16.mxu0 %v2319_v5 }
0x1291   :  { %2079 = vmatpush3.bf16.msra.mxu0 %v2555_v59 }
0x1292   :  { %2092 = vmatprep.subr.bf16.mxu0 %v2319_v5 }
0x1294   :  { %2081 = vmatmul.mubr.bf16.vlgmr.msra.gmra.mxu0 %v2321_v9 }
0x1295   :  { %2093 = vmatpush3.bf16.msra.mxu0 %v2548_v1  ;;  %2096 = vmatprep.mubr.msk.bf16.mxu0 %vm2320_vm2, %v2319_v5 }
0x1296   :  { %2094 = vmatprep.subr.bf16.mxu0 %v2319_v5 }
0x1299   :  { %2095 = vmatpush3.bf16.msra.mxu0 %v2555_v59 }
0x129a   :  { %2108 = vmatprep.subr.bf16.mxu0 %v2319_v5 }
0x12f2   :  { %v778_v60 = vpop.permute.xlu1 %777 }
0x12f3   :  { %2057 = vmatmul.mubr.msk.bf16.vlgmr.msra.gmra.mxu1 %vm207_vm3, %v778_v60 }
0x12f4   :  { %2069 = vmatpush3.bf16.msra.mxu1 %v2165_v43 }
0x12f5   :  { %2070 = vmatprep.subr.bf16.mxu1 %v2166_v30 }
0x12f8   :  { %2071 = vmatpush3.bf16.msra.mxu1 %v2166_v30 }
0x12f9   :  { %2084 = vmatprep.subr.bf16.mxu1 %v2319_v5 }
0x134c   :  { %v2571_v9 = vpop.f32.mrf.mxu0 }
0x134e   :  { %v937_v61 = vpop.f32.mrf.mxu0 }
0x134f   :  { %v938_v2 = vadd.f32 %v2578_v63, %v937_v61 }
0x1350   :  { %v2573_v62 = vpop.f32.mrf.mxu0 }
0x1352   :  { %v2580_v0 = vpop.f32.mrf.mxu0 }
0x1354   :  { %v1076_v17 = vpop.f32.mrf.mxu0 }
0x1355   :  { %v1082_v3 = vadd.f32 %v1076_v17, %v938_v2 }
0x1356   :  { %v2082_v4 = vpop.f32.mrf.mxu0 }
0x1357   :  { %2231 = vtanh.f32 %v1082_v3  ;;  %v1852_v15 = vmul.f32 -1.442695, %v1082_v3 }
0x1358   :  { %v1079_v6 = vpop.f32.mrf.mxu0 }
0x135a   :  { %v2083_v11 = vpop.f32.mrf.mxu0 }
0x1364   :  { %v2232_v13 = vpop.eup %2231 }
0x1365   :  { %1092 = vrot.lane.b32.xlu1 %v2232_v13, %s2322_s3 }
0x13b3   :  { %v816_v16 = vpop.f32.mrf.mxu1 }
0x13b4   :  { %v822_v18 = vadd.f32 %v816_v16, %v2430_v21 }
0x13b5   :  { %v2058_v20 = vpop.f32.mrf.mxu1 }
0x13b6   :  { %2233 = vtanh.f32 %v822_v18  ;;  %v1837_v28 = vmul.f32 -1.442695, %v822_v18 }
0x13b7   :  { %2235 = vpow2.f32 %v1852_v15  ;;  %v819_v22 = vpop.f32.mrf.mxu1 }
0x13b9   :  { %v2059_v23 = vpop.f32.mrf.mxu1 }
0x13c3   :  { %v2234_v7 = vpop.eup %2233 }
0x13c4   :  { %v2236_v25 = vpop.eup %2235  ;;  %832 = vrot.lane.b32.xlu0 %v2234_v7, %s2322_s3  ;;  %v946_v7 = vadd.f32 %v2571_v9, %v2578_v63 }
0x13c5   :  { %v1086_v26 = vadd.f32 1.0, %v2236_v25 }
0x13c7   :  { %2237 = vrcp.f32 %v1086_v26 }
0x13c8   :  { %2239 = vpow2.f32 %v1837_v28 }
0x13d4   :  { %v2238_v12 = vpop.eup %2237 }
0x13d5   :  { %v2240_v24 = vpop.eup %2239  ;;  %v1090_v34 = vmul.f32 0.0, %v2238_v12 }
0x13d6   :  { %v826_v21 = vadd.f32 1.0, %v2240_v24 }
0x13d7   :  { %v1093_v27 = vpop.permute.xlu1 %1092 }
0x13d8   :  { %v1095_v8 = vmul.f32 %v2238_v12, %v1093_v27  ;;  %2241 = vrcp.f32 %v826_v21 }
0x13da   :  { %1097 = vrot.lane.b32.xlu1 %v1095_v8, %s2322_s3 }
0x13e5   :  { %v2242_v29 = vpop.eup %2241 }
0x13e6   :  { %v830_v38 = vmul.f32 %v2242_v29, %v2521_v48 }
0x1436   :  { %v833_v31 = vpop.permute.xlu0 %832 }
0x1437   :  { %v835_v32 = vmul.f32 %v2242_v29, %v833_v31 }
0x1439   :  { %837 = vrot.lane.b32.xlu0 %v835_v32, %s2322_s3 }
0x144c   :  { %v1098_v35 = vpop.permute.xlu1 %1097 }
0x144d   :  { %v2588_v36 = vadd.f32 %v1098_v35, %v1090_v34 }
0x144f   :  { %2243 = vtanh.f32 %v2588_v36 }
0x145c   :  { %v2244_v37 = vpop.eup %2243 }
0x145d   :  { %1103 = vrot.lane.b32.xlu1 %v2244_v37, %s2322_s3 }
0x1461   :  { %687 = vrot.lane.b32.xlu1 %v2509_v33, %s2323_s18 }
0x14ab   :  { %v838_v39 = vpop.permute.xlu0 %837 }
0x14ac   :  { %v840_v40 = vadd.f32 %v838_v39, %v830_v38 }
0x14ae   :  { %2245 = vtanh.f32 %v840_v40 }
0x14bb   :  { %v2246_v41 = vpop.eup %2245 }
0x14bc   :  { %843 = vrot.lane.b32.xlu0 %v2246_v41, %s2322_s3 }
0x14c0   :  { %605 = vrot.lane.b32.xlu0 %v2495_v10, %s2323_s18 }
0x14c4   :  { %769 = vrot.lane.b32.xlu0 %v2538_v55, %s2323_s18  ;;  %v941_v55 = vadd.f32 %v2578_v63, %v2580_v0 }
0x14cf   :  { %v1104_v42 = vpop.permute.xlu1 %1103 }
0x14d0   :  { %v1106_v44 = vmul.f32 %v2238_v12, %v1104_v42  ;;  %v949_v42 = vadd.f32 %v2573_v62, %v2578_v63 }
0x14d2   :  { %v2600_v45 = vpack.c.bf16 %v1106_v44, %v1106_v44 }
0x14d3   :  { %v688_v46 = vpop.permute.xlu1 %687 }
0x14d4   :  { %691 = vst.msk [vmem:[#allocation2 + $0x14] sm:$0xf] %vm283_vm4, %v688_v46  ;;  %1116 = vrot.lane.b32.xlu0 %v2600_v45, %s2323_s18 }
0x152e   :  { %v844_v33 = vpop.permute.xlu0 %843 }
0x152f   :  { %v846_v19 = vmul.f32 %v2242_v29, %v844_v33 }
0x1531   :  { %v1888_v14 = vpack.c.bf16 %v846_v19, %v846_v19 }
0x1532   :  { %v606_v47 = vpop.permute.xlu0 %605 }
0x1533   :  { %609 = vst.msk [vmem:[#allocation2 + $0x10] sm:$0xf] %vm283_vm4, %v606_v47  ;;  %851 = vrot.lane.b32.xlu1 %v1888_v14, %s2323_s18 }
0x1536   :  { %v770_v10 = vpop.permute.xlu0 %769 }
0x1537   :  { %773 = vst.msk [vmem:[#allocation2 + $0x18] sm:$0xf] %vm283_vm4, %v770_v10 }
0x153a   :  { %v2171_v48 = vld [vmem:[#allocation2 + $0x10] sm:$0xff]  }
0x153b   :  { %2072 = vmatprep.mubr.msk.bf16.mxu1 %vm207_vm3, %v2171_v48 }
0x1546   :  { %v1117_v43 = vpop.permute.xlu0 %1116 }
0x15a5   :  { %v852_v49 = vpop.permute.xlu1 %851 }
0x15a6   :  { %855 = vst.msk [vmem:[#allocation2 + $0x1c] sm:$0xf] %vm283_vm4, %v852_v49 }
0x15ad   :  { %v2172_v51 = vld [vmem:[#allocation2 + $0x18] sm:$0xff]  }
0x15ae   :  { %2073 = vmatmul.mubr.msk.bf16.vlgmr.msra.gmra.mxu1 %vm207_vm3, %v2172_v51 }
0x15af   :  { %2085 = vmatpush3.bf16.msra.mxu1 %v2548_v1  ;;  %2088 = vmatprep.mubr.msk.bf16.mxu1 %vm2320_vm2, %v2319_v5 }
0x15b0   :  { %2086 = vmatprep.subr.bf16.mxu1 %v2319_v5 }
0x15b3   :  { %2087 = vmatpush3.bf16.msra.mxu1 %v2555_v59 }
0x15b4   :  { %2100 = vmatprep.subr.bf16.mxu1 %v2319_v5 }
0x15b6   :  { %2089 = vmatmul.mubr.msk.bf16.vlgmr.msra.gmra.mxu1 %vm207_vm3, %v1117_v43 }
0x15b7   :  { %2101 = vmatpush3.bf16.msra.mxu1 %v2548_v1  ;;  %2104 = vmatprep.mubr.msk.bf16.mxu1 %vm2320_vm2, %v2319_v5 }
0x15b8   :  { %2102 = vmatprep.subr.bf16.mxu1 %v2319_v5 }
0x15bb   :  { %2103 = vmatpush3.bf16.msra.mxu1 %v2555_v59 }
0x15bc   :  { %2116 = vmatprep.subr.bf16.mxu1 %v2319_v5 }
0x166e   :  { %v2624_v30 = vpop.f32.mrf.mxu1 }
0x1670   :  { %v2626_v52 = vpop.f32.mrf.mxu1 }
0x1672   :  { %v2628_v53 = vpop.f32.mrf.mxu1 }
0x1674   :  { %v2630_v54 = vpop.f32.mrf.mxu1 }
0x1676   :  { %v1155_v56 = vpop.f32.mrf.mxu1 }
0x1677   :  { %v1161_v57 = vadd.f32 %v1155_v56, %v941_v55 }
0x1678   :  { %v2090_v58 = vpop.f32.mrf.mxu1 }
0x1679   :  { %2247 = vtanh.f32 %v1161_v57  ;;  %v1855_v2 = vmul.f32 -1.442695, %v1161_v57 }
0x167a   :  { %v1158_v50 = vpop.f32.mrf.mxu1 }
0x167b   :  { %2249 = vpow2.f32 %v1855_v2 }
0x167c   :  { %v2091_v60 = vpop.f32.mrf.mxu1 }
0x1686   :  { %v2248_v61 = vpop.eup %2247 }
0x1687   :  { %1171 = vrot.lane.b32.xlu1 %v2248_v61, %s2322_s3 }
0x1688   :  { %v2250_v17 = vpop.eup %2249 }
0x1689   :  { %v1165_v3 = vadd.f32 1.0, %v2250_v17  ;;  %v1011_v17 = vadd.f32 %v2578_v63, %v2626_v52 }
0x168b   :  { %2251 = vrcp.f32 %v1165_v3 }
0x1698   :  { %v2252_v4 = vpop.eup %2251 }
0x1699   :  { %v1169_v0 = vmul.f32 %v2252_v4, %v2588_v36 }
0x16f9   :  { %v1172_v6 = vpop.permute.xlu1 %1171 }
0x16fa   :  { %v1174_v11 = vmul.f32 %v2252_v4, %v1172_v6 }
0x16fc   :  { %1176 = vrot.lane.b32.xlu0 %v1174_v11, %s2322_s3 }
0x176e   :  { %v1177_v13 = vpop.permute.xlu0 %1176 }
0x176f   :  { %v1179_v15 = vadd.f32 %v1177_v13, %v1169_v0 }
0x1771   :  { %2253 = vtanh.f32 %v1179_v15 }
0x177e   :  { %v2254_v16 = vpop.eup %2253 }
0x177f   :  { %1182 = vrot.lane.b32.xlu1 %v2254_v16, %s2322_s3 }
0x17f1   :  { %v1183_v18 = vpop.permute.xlu1 %1182 }
0x17f2   :  { %v1185_v20 = vmul.f32 %v2252_v4, %v1183_v18 }
0x17f4   :  { %v2638_v22 = vpack.c.bf16 %v1185_v20, %v1185_v20 }
0x17f6   :  { %1195 = vrot.lane.b32.xlu0 %v2638_v22, %s2323_s18 }
0x1868   :  { %v1196_v23 = vpop.permute.xlu0 %1195 }
0x1869   :  { %2097 = vmatmul.mubr.msk.bf16.vlgmr.msra.gmra.mxu0 %vm207_vm3, %v1196_v23 }
0x186a   :  { %2109 = vmatpush3.bf16.msra.mxu0 %v2548_v1  ;;  %2112 = vmatprep.mubr.msk.bf16.mxu0 %vm2320_vm2, %v2319_v5 }
0x186b   :  { %2110 = vmatprep.subr.bf16.mxu0 %v2319_v5 }
0x186e   :  { %2111 = vmatpush3.bf16.msra.mxu0 %v2555_v59 }
0x186f   :  { %2124 = vmatprep.subr.bf16.mxu0 %v2319_v5 }
0x1929   :  { %v1234_v25 = vpop.f32.mrf.mxu0 }
0x192a   :  { %v1240_v26 = vadd.f32 %v1234_v25, %v946_v7 }
0x192b   :  { %v2098_v12 = vpop.f32.mrf.mxu0 }
0x192c   :  { %2255 = vtanh.f32 %v1240_v26  ;;  %v1858_v24 = vmul.f32 -1.442695, %v1240_v26 }
0x192d   :  { %v1237_v27 = vpop.f32.mrf.mxu0 }
0x192e   :  { %2257 = vpow2.f32 %v1858_v24 }
0x192f   :  { %v2099_v8 = vpop.f32.mrf.mxu0 }
0x1939   :  { %v2256_v28 = vpop.eup %2255 }
0x193a   :  { %1250 = vrot.lane.b32.xlu1 %v2256_v28, %s2322_s3 }
0x193b   :  { %v2258_v21 = vpop.eup %2257 }
0x193c   :  { %v1244_v29 = vadd.f32 1.0, %v2258_v21  ;;  %v1014_v21 = vadd.f32 %v2578_v63, %v2630_v54 }
0x193e   :  { %2259 = vrcp.f32 %v1244_v29 }
0x194b   :  { %v2260_v31 = vpop.eup %2259 }
0x194c   :  { %v1248_v9 = vmul.f32 %v2260_v31, %v1179_v15 }
0x19ac   :  { %v1251_v32 = vpop.permute.xlu1 %1250 }
0x19ad   :  { %v1253_v34 = vmul.f32 %v2260_v31, %v1251_v32 }
0x19af   :  { %1255 = vrot.lane.b32.xlu0 %v1253_v34, %s2322_s3 }
0x1a21   :  { %v1256_v35 = vpop.permute.xlu0 %1255 }
0x1a22   :  { %v1258_v36 = vadd.f32 %v1256_v35, %v1248_v9 }
0x1a24   :  { %2261 = vtanh.f32 %v1258_v36 }
0x1a31   :  { %v2262_v37 = vpop.eup %2261 }
0x1a32   :  { %1261 = vrot.lane.b32.xlu1 %v2262_v37, %s2322_s3 }
0x1aa4   :  { %v1262_v38 = vpop.permute.xlu1 %1261 }
0x1aa5   :  { %v1264_v39 = vmul.f32 %v2260_v31, %v1262_v38 }
0x1aa7   :  { %v2654_v40 = vpack.c.bf16 %v1264_v39, %v1264_v39 }
0x1aa9   :  { %1274 = vrot.lane.b32.xlu0 %v2654_v40, %s2323_s18 }
0x1b1b   :  { %v1275_v41 = vpop.permute.xlu0 %1274 }
0x1b1c   :  { %2105 = vmatmul.mubr.msk.bf16.vlgmr.msra.gmra.mxu1 %vm207_vm3, %v1275_v41 }
0x1b1d   :  { %2117 = vmatpush3.bf16.msra.mxu1 %v2548_v1  ;;  %2120 = vmatprep.mubr.msk.bf16.mxu1 %vm2320_vm2, %v2319_v5 }
0x1b1e   :  { %2118 = vmatprep.subr.bf16.mxu1 %v2319_v5 }
0x1b21   :  { %2119 = vmatpush3.bf16.msra.mxu1 %v2555_v59 }
0x1b22   :  { %2132 = vmatprep.subr.bf16.mxu1 %v2319_v5 }
0x1bdc   :  { %v1313_v44 = vpop.f32.mrf.mxu1 }
0x1bdd   :  { %v1319_v46 = vadd.f32 %v1313_v44, %v949_v42 }
0x1bde   :  { %v2106_v33 = vpop.f32.mrf.mxu1 }
0x1bdf   :  { %2263 = vtanh.f32 %v1319_v46  ;;  %v1861_v10 = vmul.f32 -1.442695, %v1319_v46 }
0x1be0   :  { %v1316_v19 = vpop.f32.mrf.mxu1 }
0x1be1   :  { %2265 = vpow2.f32 %v1861_v10 }
0x1be2   :  { %v2107_v14 = vpop.f32.mrf.mxu1 }
0x1be3   :  { %v1019_v14 = vadd.f32 %v2624_v30, %v2578_v63 }
0x1bec   :  { %v2264_v47 = vpop.eup %2263 }
0x1bed   :  { %1329 = vrot.lane.b32.xlu1 %v2264_v47, %s2322_s3 }
0x1bee   :  { %v2266_v48 = vpop.eup %2265 }
0x1bef   :  { %v1323_v49 = vadd.f32 1.0, %v2266_v48 }
0x1bf1   :  { %2267 = vrcp.f32 %v1323_v49 }
0x1bfe   :  { %v2268_v51 = vpop.eup %2267 }
0x1bff   :  { %v1327_v62 = vmul.f32 %v2268_v51, %v1258_v36 }
0x1c5f   :  { %v1330_v43 = vpop.permute.xlu1 %1329 }
0x1c60   :  { %v1332_v55 = vmul.f32 %v2268_v51, %v1330_v43 }
0x1c62   :  { %1334 = vrot.lane.b32.xlu0 %v1332_v55, %s2322_s3 }
0x1cd4   :  { %v1335_v56 = vpop.permute.xlu0 %1334 }
0x1cd5   :  { %v1337_v57 = vadd.f32 %v1335_v56, %v1327_v62 }
0x1cd7   :  { %2269 = vtanh.f32 %v1337_v57 }
0x1ce4   :  { %v2270_v58 = vpop.eup %2269 }
0x1ce5   :  { %1340 = vrot.lane.b32.xlu1 %v2270_v58, %s2322_s3 }
0x1d57   :  { %v1341_v50 = vpop.permute.xlu1 %1340 }
0x1d58   :  { %v1343_v60 = vmul.f32 %v2268_v51, %v1341_v50 }
0x1d5a   :  { %v2670_v61 = vpack.c.bf16 %v1343_v60, %v1343_v60 }
0x1d5c   :  { %1353 = vrot.lane.b32.xlu0 %v2670_v61, %s2323_s18 }
0x1dce   :  { %v1354_v2 = vpop.permute.xlu0 %1353 }
0x1dcf   :  { %2113 = vmatmul.mubr.msk.bf16.vlgmr.msra.gmra.mxu0 %vm207_vm3, %v1354_v2 }
0x1dd0   :  { %2125 = vmatpush3.bf16.msra.mxu0 %v2548_v1  ;;  %2128 = vmatprep.mubr.msk.bf16.mxu0 %vm2320_vm2, %v2319_v5 }
0x1dd1   :  { %2126 = vmatprep.subr.bf16.mxu0 %v2319_v5 }
0x1dd4   :  { %2127 = vmatpush3.bf16.msra.mxu0 %v2555_v59 }
0x1e8f   :  { %v1392_v3 = vpop.f32.mrf.mxu0 }
0x1e90   :  { %v1398_v4 = vadd.f32 %v1392_v3, %v1011_v17 }
0x1e91   :  { %v2114_v6 = vpop.f32.mrf.mxu0 }
0x1e92   :  { %2271 = vtanh.f32 %v1398_v4  ;;  %v1864_v15 = vmul.f32 -1.442695, %v1398_v4 }
0x1e93   :  { %v1395_v11 = vpop.f32.mrf.mxu0 }
0x1e94   :  { %2273 = vpow2.f32 %v1864_v15 }
0x1e95   :  { %v2115_v0 = vpop.f32.mrf.mxu0 }
0x1e96   :  { %v1022_v0 = vadd.f32 %v2628_v53, %v2578_v63 }
0x1e9f   :  { %v2272_v13 = vpop.eup %2271 }
0x1ea0   :  { %1408 = vrot.lane.b32.xlu1 %v2272_v13, %s2322_s3 }
0x1ea1   :  { %v2274_v16 = vpop.eup %2273 }
0x1ea2   :  { %v1402_v18 = vadd.f32 1.0, %v2274_v16 }
0x1ea4   :  { %2275 = vrcp.f32 %v1402_v18 }
0x1eb1   :  { %v2276_v20 = vpop.eup %2275 }
0x1eb2   :  { %v1406_v52 = vmul.f32 %v2276_v20, %v1337_v57 }
0x1f12   :  { %v1409_v23 = vpop.permute.xlu1 %1408 }
0x1f13   :  { %v1411_v7 = vmul.f32 %v2276_v20, %v1409_v23 }
0x1f15   :  { %1413 = vrot.lane.b32.xlu0 %v1411_v7, %s2322_s3 }
0x1f87   :  { %v1414_v25 = vpop.permute.xlu0 %1413 }
0x1f88   :  { %v1416_v26 = vadd.f32 %v1414_v25, %v1406_v52 }
0x1f8a   :  { %2277 = vtanh.f32 %v1416_v26 }
0x1f97   :  { %v2278_v12 = vpop.eup %2277 }
0x1f98   :  { %1419 = vrot.lane.b32.xlu1 %v2278_v12, %s2322_s3 }
0x200a   :  { %v1420_v27 = vpop.permute.xlu1 %1419 }
0x200b   :  { %v1422_v8 = vmul.f32 %v2276_v20, %v1420_v27 }
0x200d   :  { %v2685_v28 = vpack.c.bf16 %v1422_v8, %v1422_v8 }
0x200f   :  { %1432 = vrot.lane.b32.xlu0 %v2685_v28, %s2323_s18 }
0x2081   :  { %v1433_v24 = vpop.permute.xlu0 %1432 }
0x2082   :  { %2121 = vmatmul.mubr.msk.bf16.vlgmr.msra.gmra.mxu1 %vm207_vm3, %v1433_v24 }
0x2083   :  { %2133 = vmatpush3.bf16.msra.mxu1 %v2548_v1  ;;  %2136 = vmatprep.mubr.msk.bf16.mxu1 %vm2320_vm2, %v2319_v5 }
0x2084   :  { %2134 = vmatprep.subr.bf16.mxu1 %v2319_v5 }
0x2087   :  { %2135 = vmatpush3.bf16.msra.mxu1 %v2555_v59 }
0x2142   :  { %v1471_v29 = vpop.f32.mrf.mxu1 }
0x2143   :  { %v1477_v31 = vadd.f32 %v1471_v29, %v1014_v21 }
0x2144   :  { %v2122_v32 = vpop.f32.mrf.mxu1 }
0x2145   :  { %2279 = vtanh.f32 %v1477_v31  ;;  %v1867_v1 = vmul.f32 -1.442695, %v1477_v31  ;;  %v2174_v31 = vld [vmem:[%s2788_s7] sm:$0xff]  }
0x2146   :  { %v1474_v34 = vpop.f32.mrf.mxu1 }
0x2147   :  { %2281 = vpow2.f32 %v1867_v1 }
0x2148   :  { %v2123_v9 = vpop.f32.mrf.mxu1 }
0x2152   :  { %v2280_v35 = vpop.eup %2279 }
0x2153   :  { %1487 = vrot.lane.b32.xlu1 %v2280_v35, %s2322_s3 }
0x2154   :  { %v2282_v36 = vpop.eup %2281 }
0x2155   :  { %v1481_v37 = vadd.f32 1.0, %v2282_v36 }
0x2157   :  { %2283 = vrcp.f32 %v1481_v37 }
0x2164   :  { %v2284_v5 = vpop.eup %2283 }
0x2165   :  { %v1485_v54 = vmul.f32 %v2284_v5, %v1416_v26 }
0x21c5   :  { %v1488_v38 = vpop.permute.xlu1 %1487 }
0x21c6   :  { %v1490_v59 = vmul.f32 %v2284_v5, %v1488_v38 }
0x21c8   :  { %1492 = vrot.lane.b32.xlu0 %v1490_v59, %s2322_s3 }
0x223a   :  { %v1493_v39 = vpop.permute.xlu0 %1492 }
0x223b   :  { %v1495_v41 = vadd.f32 %v1493_v39, %v1485_v54 }
0x223d   :  { %2285 = vtanh.f32 %v1495_v41 }
0x224a   :  { %v2286_v42 = vpop.eup %2285 }
0x224b   :  { %1498 = vrot.lane.b32.xlu1 %v2286_v42, %s2322_s3 }
0x22bd   :  { %v1499_v44 = vpop.permute.xlu1 %1498 }
0x22be   :  { %v1501_v46 = vmul.f32 %v2284_v5, %v1499_v44 }
0x22c0   :  { %v2700_v33 = vpack.c.bf16 %v1501_v46, %v1501_v46 }
0x22c2   :  { %1511 = vrot.lane.b32.xlu0 %v2700_v33, %s2323_s18 }
0x2334   :  { %v1512_v19 = vpop.permute.xlu0 %1511 }
0x2335   :  { %2129 = vmatmul.mubr.msk.bf16.vlgmr.msra.gmra.mxu0 %vm207_vm3, %v1512_v19 }
0x23f5   :  { %v1550_v47 = vpop.f32.mrf.mxu0 }
0x23f6   :  { %v1556_v10 = vadd.f32 %v1550_v47, %v1019_v14 }
0x23f7   :  { %v2130_v48 = vpop.f32.mrf.mxu0 }
0x23f8   :  { %2287 = vtanh.f32 %v1556_v10  ;;  %v1870_v55 = vmul.f32 -1.442695, %v1556_v10 }
0x23f9   :  { %v1553_v49 = vpop.f32.mrf.mxu0 }
0x23fa   :  { %2289 = vpow2.f32 %v1870_v55 }
0x23fb   :  { %v2131_v51 = vpop.f32.mrf.mxu0 }
0x2405   :  { %v2288_v43 = vpop.eup %2287 }
0x2406   :  { %1566 = vrot.lane.b32.xlu1 %v2288_v43, %s2322_s3 }
0x2407   :  { %v2290_v62 = vpop.eup %2289 }
0x2408   :  { %v1560_v56 = vadd.f32 1.0, %v2290_v62 }
0x240a   :  { %2291 = vrcp.f32 %v1560_v56 }
0x2417   :  { %v2292_v57 = vpop.eup %2291 }
0x2418   :  { %v1564_v30 = vmul.f32 %v2292_v57, %v1495_v41 }
0x2478   :  { %v1567_v58 = vpop.permute.xlu1 %1566 }
0x2479   :  { %v1569_v50 = vmul.f32 %v2292_v57, %v1567_v58 }
0x247b   :  { %1571 = vrot.lane.b32.xlu0 %v1569_v50, %s2322_s3 }
0x24ed   :  { %v1572_v60 = vpop.permute.xlu0 %1571 }
0x24ee   :  { %v1574_v2 = vadd.f32 %v1572_v60, %v1564_v30 }
0x24f0   :  { %2293 = vtanh.f32 %v1574_v2 }
0x24fd   :  { %v2294_v17 = vpop.eup %2293 }
0x24fe   :  { %1577 = vrot.lane.b32.xlu1 %v2294_v17, %s2322_s3 }
0x2570   :  { %v1578_v3 = vpop.permute.xlu1 %1577 }
0x2571   :  { %v1580_v4 = vmul.f32 %v2292_v57, %v1578_v3 }
0x2573   :  { %v1581_v6 = vpack.c.bf16 %v1580_v4, %v1580_v4 }
0x2575   :  { %1590 = vrot.lane.b32.xlu0 %v1581_v6, %s2323_s18 }
0x25e7   :  { %v1591_v11 = vpop.permute.xlu0 %1590 }
0x25e8   :  { %2137 = vmatmul.mubr.msk.bf16.vlgmr.msra.gmra.mxu1 %vm207_vm3, %v1591_v11 }
0x26a8   :  { %v1629_v13 = vpop.f32.mrf.mxu1 }
0x26a9   :  { %v1635_v15 = vadd.f32 %v1629_v13, %v1022_v0 }
0x26aa   :  { %v2138_v16 = vpop.f32.mrf.mxu1 }
0x26ab   :  { %2295 = vtanh.f32 %v1635_v15  ;;  %v1873_v7 = vmul.f32 -1.442695, %v1635_v15 }
0x26ac   :  { %v1632_v18 = vpop.f32.mrf.mxu1 }
0x26ad   :  { %2297 = vpow2.f32 %v1873_v7 }
0x26ae   :  { %v2139_v20 = vpop.f32.mrf.mxu1 }
0x26b8   :  { %v2296_v23 = vpop.eup %2295 }
0x26b9   :  { %1645 = vrot.lane.b32.xlu1 %v2296_v23, %s2322_s3 }
0x26ba   :  { %v2298_v52 = vpop.eup %2297 }
0x26bb   :  { %v1639_v25 = vadd.f32 1.0, %v2298_v52 }
0x26bd   :  { %2299 = vrcp.f32 %v1639_v25 }
0x26ca   :  { %v2300_v26 = vpop.eup %2299 }
0x26cb   :  { %v1643_v63 = vmul.f32 %v2300_v26, %v1574_v2 }
0x272b   :  { %v1646_v12 = vpop.permute.xlu1 %1645 }
0x272c   :  { %v1648_v27 = vmul.f32 %v2300_v26, %v1646_v12 }
0x272e   :  { %1650 = vrot.lane.b32.xlu0 %v1648_v27, %s2322_s3 }
0x2732   :  { %1111 = vrot.lane.b32.xlu0 %v2600_v45, %s2323_s18 }
0x2736   :  { %1269 = vrot.lane.b32.xlu0 %v2654_v40, %s2323_s18 }
0x273a   :  { %1427 = vrot.lane.b32.xlu0 %v2685_v28, %s2323_s18  ;;  %v2173_v28 = vld [vmem:[%s2788_s7 + $0x8] sm:$0xff]  }
0x273b   :  { %2140 = vmatprep.subr.bf16.mxu0 %v2173_v28 }
0x273c   :  { %2141 = vmatpush3.bf16.msra.mxu0 %v2173_v28 }
0x273d   :  { %2142 = vmatprep.subr.bf16.mxu0 %v2174_v31 }
0x273e   :  { %1585 = vrot.lane.b32.xlu0 %v1581_v6, %s2323_s18 }
0x2740   :  { %2143 = vmatpush3.bf16.msra.mxu0 %v2174_v31 }
0x27a0   :  { %v1651_v53 = vpop.permute.xlu0 %1650 }
0x27a1   :  { %v1653_v8 = vadd.f32 %v1651_v53, %v1643_v63 }
0x27a3   :  { %2301 = vtanh.f32 %v1653_v8 }
0x27a4   :  { %v1112_v24 = vpop.permute.xlu0 %1111 }
0x27a5   :  { %1114 = vst.msk [vmem:[#allocation2] sm:$0xf] %vm283_vm4, %v1112_v24 }
0x27a8   :  { %v1270_v21 = vpop.permute.xlu0 %1269 }
0x27a9   :  { %1272 = vst.msk [vmem:[#allocation2 + $0x8] sm:$0xf] %vm283_vm4, %v1270_v21 }
0x27ac   :  { %v1428_v29 = vpop.permute.xlu0 %1427 }
0x27ad   :  { %1430 = vst.msk [vmem:[#allocation2 + $0x10] sm:$0xf] %vm283_vm4, %v1428_v29 }
0x27b0   :  { %v2302_v45 = vpop.eup %2301  ;;  %v1586_v40 = vpop.permute.xlu0 %1585 }
0x27b1   :  { %1588 = vst.msk [vmem:[#allocation2 + $0x18] sm:$0xf] %vm283_vm4, %v1586_v40  ;;  %1656 = vrot.lane.b32.xlu1 %v2302_v45, %s2322_s3 }
0x27b5   :  { %1190 = vrot.lane.b32.xlu1 %v2638_v22, %s2323_s18 }
0x27b9   :  { %1348 = vrot.lane.b32.xlu1 %v2670_v61, %s2323_s18 }
0x27bd   :  { %1506 = vrot.lane.b32.xlu1 %v2700_v33, %s2323_s18 }
0x2823   :  { %v1657_v32 = vpop.permute.xlu1 %1656 }
0x2824   :  { %v1659_v34 = vmul.f32 %v2300_v26, %v1657_v32 }
0x2826   :  { %v1896_v9 = vpack.c.bf16 %v1659_v34, %v1659_v34 }
0x2827   :  { %v1191_v35 = vpop.permute.xlu1 %1190 }
0x2828   :  { %1193 = vst.msk [vmem:[#allocation2 + $0x4] sm:$0xf] %vm283_vm4, %v1191_v35  ;;  %1664 = vrot.lane.b32.xlu1 %v1896_v9, %s2323_s18 }
0x282b   :  { %v1349_v1 = vpop.permute.xlu1 %1348 }
0x282c   :  { %1351 = vst.msk [vmem:[#allocation2 + $0xc] sm:$0xf] %vm283_vm4, %v1349_v1 }
0x282f   :  { %v1507_v22 = vpop.permute.xlu1 %1506  ;;  %v1898_v36 = vld [vmem:[#allocation2] sm:$0xff]  }
0x2830   :  { %1509 = vst.msk [vmem:[#allocation2 + $0x14] sm:$0xf] %vm283_vm4, %v1507_v22  ;;  %v1899_v37 = vunpack.c.l.bf16 %v1898_v36  ;;  %v1900_v61 = vunpack.c.h.bf16 %v1898_v36 }
0x2832   :  { %2303 = vtanh.f32 %v1899_v37 }
0x2833   :  { %2305 = vtanh.f32 %v1900_v61  ;;  %v1913_v5 = vld [vmem:[#allocation2 + $0x8] sm:$0xff]  }
0x2834   :  { %v1903_v38 = vunpack.c.l.bf16 %v1913_v5  ;;  %v1904_v59 = vunpack.c.h.bf16 %v1913_v5 }
0x2836   :  { %2307 = vtanh.f32 %v1903_v38 }
0x2837   :  { %2309 = vtanh.f32 %v1904_v59  ;;  %v1914_v54 = vld [vmem:[#allocation2 + $0x10] sm:$0xff]  }
0x2838   :  { %v1907_v39 = vunpack.c.l.bf16 %v1914_v54  ;;  %v1908_v41 = vunpack.c.h.bf16 %v1914_v54 }
0x283a   :  { %2311 = vtanh.f32 %v1907_v39 }
0x283b   :  { %2313 = vtanh.f32 %v1908_v41 }
0x283f   :  { %v2304_v42 = vpop.eup %2303 }
0x2840   :  { %v2306_v44 = vpop.eup %2305 }
0x2841   :  { %v1692_v46 = vpack.c.bf16 %v2306_v44, %v2304_v42 }
0x2843   :  { %v2308_v33 = vpop.eup %2307  ;;  %2144 = vmatprep.mubr.msk.bf16.mxu0 %vm207_vm3, %v1692_v46 }
0x2844   :  { %v2310_v19 = vpop.eup %2309 }
0x2845   :  { %v1693_v14 = vpack.c.bf16 %v2310_v19, %v2308_v33 }
0x2847   :  { %v2312_v47 = vpop.eup %2311  ;;  %2145 = vmatmul.mubr.msk.bf16.vlgmr.msra.gmra.mxu0 %vm207_vm3, %v1693_v14 }
0x2848   :  { %v2314_v10 = vpop.eup %2313 }
0x2849   :  { %v1694_v48 = vpack.c.bf16 %v2314_v10, %v2312_v47 }
0x284b   :  { %2148 = vmatprep.mubr.msk.bf16.mxu0 %vm207_vm3, %v1694_v48 }
0x289a   :  { %v1665_v49 = vpop.permute.xlu1 %1664 }
0x289b   :  { %1667 = vst.msk [vmem:[#allocation2 + $0x1c] sm:$0xf] %vm283_vm4, %v1665_v49 }
0x28a2   :  { %v1915_v51 = vld [vmem:[#allocation2 + $0x18] sm:$0xff]  }
0x28a3   :  { %v1911_v43 = vunpack.c.l.bf16 %v1915_v51  ;;  %v1912_v55 = vunpack.c.h.bf16 %v1915_v51 }
0x28a5   :  { %2315 = vtanh.f32 %v1911_v43 }
0x28a6   :  { %2317 = vtanh.f32 %v1912_v55 }
0x28b2   :  { %v2316_v62 = vpop.eup %2315 }
0x28b3   :  { %v2318_v56 = vpop.eup %2317 }
0x28b4   :  { %v1695_v57 = vpack.c.bf16 %v2318_v56, %v2316_v62 }
0x28b6   :  { %2149 = vmatmul.mubr.msk.bf16.gmra.mxu0 %vm207_vm3, %v1695_v57 }
0x2907   :  { %v2146_v58 = vpop.f32.mrf.mxu0 }
0x2908   :  { %1791 = vst.msk [vmem:[%s2789_s8 + $0x10] sm:$0xff] %vm56_vm1, %v2146_v58 }
0x2909   :  { %v1758_v50 = vpop.f32.mrf.mxu0 }
0x290a   :  { %1789 = vst.msk [vmem:[%s2789_s8] sm:$0xff] %vm56_vm1, %v1758_v50 }
0x290b   :  { %v2147_v30 = vpop.f32.mrf.mxu0 }
0x290c   :  { %1792 = vst.msk [vmem:[%s2789_s8 + $0x18] sm:$0xff] %vm56_vm1, %v2147_v30 }
0x290d   :  { %v1761_v60 = vpop.f32.mrf.mxu0 }
0x290e   :  { %1790 = vst.msk [vmem:[%s2789_s8 + $0x8] sm:$0xff] %vm56_vm1, %v1761_v60 }
0x2976   :  { %v2150_v2 = vpop.f32.mrf.mxu0 }
0x2977   :  { %1795 = vst.msk [vmem:[%s2789_s8 + $0x30] sm:$0xff] %vm56_vm1, %v2150_v2 }
0x2978   :  { %v1774_v17 = vpop.f32.mrf.mxu0 }
0x2979   :  { %1793 = vst.msk [vmem:[%s2789_s8 + $0x20] sm:$0xff] %vm56_vm1, %v1774_v17 }
0x297a   :  { %v2151_v3 = vpop.f32.mrf.mxu0 }
0x297b   :  { %1796 = vst.msk [vmem:[%s2789_s8 + $0x38] sm:$0xff] %vm56_vm1, %v2151_v3 }
0x297c   :  { %v1777_v4 = vpop.f32.mrf.mxu0 }
0x297d   :  { %1794 = vst.msk [vmem:[%s2789_s8 + $0x28] sm:$0xff] %vm56_vm1, %v1777_v4 }

</bundles_post_ra>
